<compile_context>
chip_gen: v7x
topology: tpu7x:2x2x1
jax: 0.10.0
libtpu: 0.0.40
codegen_flags: <defaults>
</compile_context>

<pallas_src>
import functools
import math

import jax
import jax.numpy as jnp
from jax.experimental import pallas as pl
from jax.experimental.pallas import tpu as pltpu


def _layer_norm_f32(v, gamma, beta, inv_d, eps):
    """Plain LayerNorm over the (unpadded) last dim, all f32 elementwise."""
    mean = jnp.sum(v, axis=-1, keepdims=True) * inv_d
    cent = v - mean
    var = jnp.sum(cent * cent, axis=-1, keepdims=True) * inv_d
    return cent * jax.lax.rsqrt(var + eps) * gamma + beta


def _encoder_block_kernel(valid_lens_ref,                       # SMEM (B,)
                          x_ref,                                 # (bb, S, D) bf16
                          wq_ref, wk_ref, wv_ref, wo_ref,        # (D, D) bf16
                          w1_ref, b1_ref, w2_ref, b2_ref,        # FFN
                          g1_ref, be1_ref, g2_ref, be2_ref,      # LayerNorm (1, D) f32
                          o_ref,                                 # (bb, S, D) f32
                          *, num_heads, eps, batch_block, seq_len):
    nh = num_heads
    bb = batch_block
    S = seq_len
    D = x_ref.shape[-1]
    dh = D // nh
    bstart = pl.program_id(0) * bb

    x_bf = x_ref[...].reshape(bb * S, D)          # bf16 MXU operand
    x32 = x_bf.astype(jnp.float32)                # residual path in f32

    # Combined Q/K/V projections: one (bb*S, D)@(D, D) bf16 matmul each with
    # f32 accumulation.  1/sqrt(dh) is pre-folded into W_q in the wrapper.
    q = jnp.dot(x_bf, wq_ref[...], preferred_element_type=jnp.float32)
    k = jnp.dot(x_bf, wk_ref[...], preferred_element_type=jnp.float32)
    v = jnp.dot(x_bf, wv_ref[...], preferred_element_type=jnp.float32)

    # ---- attention scores for every (batch, head), stacked on the sublane
    #      axis so a single masked softmax covers bb*nh*S rows. ----
    key_pos = jax.lax.broadcasted_iota(jnp.int32, (nh * S, S), 1)  # hoisted
    score_blocks = []
    for b in range(bb):
        vlen = valid_lens_ref[bstart + b]
        qb = q[b * S:(b + 1) * S]
        kb = k[b * S:(b + 1) * S]
        sb = jnp.concatenate(
            [jax.lax.dot_general(qb[:, h * dh:(h + 1) * dh],
                                 kb[:, h * dh:(h + 1) * dh],
                                 (((1,), (1,)), ((), ())),
                                 preferred_element_type=jnp.float32)
             for h in range(nh)], axis=0)                          # (nh*S, S)
        # d2l masked_softmax: key positions >= valid_len get -1e6.
        score_blocks.append(jnp.where(key_pos < vlen, sb, -1e6))
    scores = jnp.concatenate(score_blocks, axis=0)                 # (bb*nh*S, S)

    # Numerically-stable softmax (f32); denominator on the EUP reciprocal.
    m = jnp.max(scores, axis=-1, keepdims=True)
    e = jnp.exp(scores - m)
    p = e * pl.reciprocal(jnp.sum(e, axis=-1, keepdims=True), approx=True)

    # ---- P @ V per (batch, head); concatenating heads along lanes is exactly
    #      concat(heads), which then goes through the combined W_o. ----
    ctx_blocks = []
    for b in range(bb):
        vb = v[b * S:(b + 1) * S]
        base = b * nh * S
        ctx_blocks.append(jnp.concatenate(
            [jnp.dot(p[base + h * S: base + (h + 1) * S],
                     vb[:, h * dh:(h + 1) * dh],
                     preferred_element_type=jnp.float32)
             for h in range(nh)], axis=1))                         # (S, D)
    ctx = jnp.concatenate(ctx_blocks, axis=0)                      # (bb*S, D)
    attn = jnp.dot(ctx.astype(x_bf.dtype), wo_ref[...],
                   preferred_element_type=jnp.float32)

    inv_d = 1.0 / D
    # AddNorm 1 (dropout == identity in eval mode); f32 elementwise math.
    y = _layer_norm_f32(attn + x32, g1_ref[...], be1_ref[...], inv_d, eps)

    # Position-wise FFN: dense2(relu(dense1(y))); bf16 MXU operands, f32 acc.
    hdn = jnp.dot(y.astype(x_bf.dtype), w1_ref[...],
                  preferred_element_type=jnp.float32) + b1_ref[...]
    hdn = jnp.maximum(hdn, 0.0)                                    # ReLU (VPU)
    f = jnp.dot(hdn.astype(x_bf.dtype), w2_ref[...],
                preferred_element_type=jnp.float32) + b2_ref[...]

    # AddNorm 2.
    z = _layer_norm_f32(f + y, g2_ref[...], be2_ref[...], inv_d, eps)
    o_ref[...] = z.reshape(bb, S, D).astype(o_ref.dtype)


def encoder_block(x, valid_lens, params, *, num_heads, eps=1e-5,
                  batch_block=None, interpret=False):
    """x: (B, S, D) f32, valid_lens: (B,) int -> (B, S, D) f32 (eval forward)."""
    B, S, D = x.shape
    H = params["w1"].shape[1]
    nh = num_heads
    assert D % nh == 0, "num_hiddens must be divisible by num_heads"
    dh = D // nh

    if batch_block is None:
        batch_block = B           # fold whole batch into one fat block
    assert B % batch_block == 0
    grid = (B // batch_block,)

    cdt = jnp.bfloat16            # MXU operand dtype (accumulation stays f32)
    xc = x.astype(cdt)
    wq = (params["wq"] * (1.0 / math.sqrt(dh))).astype(cdt)   # fold score scale
    wk = params["wk"].astype(cdt)
    wv = params["wv"].astype(cdt)
    wo = params["wo"].astype(cdt)
    w1 = params["w1"].astype(cdt)
    w2 = params["w2"].astype(cdt)
    b1 = params["b1"].reshape(1, H).astype(jnp.float32)
    b2 = params["b2"].reshape(1, D).astype(jnp.float32)
    g1 = params["g1"].reshape(1, D).astype(jnp.float32)
    be1 = params["be1"].reshape(1, D).astype(jnp.float32)
    g2 = params["g2"].reshape(1, D).astype(jnp.float32)
    be2 = params["be2"].reshape(1, D).astype(jnp.float32)

    kernel = functools.partial(
        _encoder_block_kernel,
        num_heads=nh, eps=eps, batch_block=batch_block, seq_len=S)

    resident = lambda i, vl: (0, 0)         # weights: DMA'd once, stay in VMEM
    per_block = lambda i, vl: (i, 0, 0)     # activations: one batch slab / step

    flops = (4 * 2 * B * S * D * D            # Q/K/V/O projections
             + 2 * 2 * B * nh * S * S * dh    # scores + attn@V
             + 2 * 2 * B * S * D * H)         # FFN dense1 + dense2
    transcendentals = B * nh * S * S + B * nh * S + 2 * B * S
    bytes_accessed = (xc.size * 2 + B * S * D * 4 + B * 4
                      + 2 * (4 * D * D + 2 * D * H) + 4 * (H + 5 * D))

    out = pl.pallas_call(
        kernel,
        out_shape=jax.ShapeDtypeStruct((B, S, D), jnp.float32),
        grid_spec=pltpu.PrefetchScalarGridSpec(
            num_scalar_prefetch=1,            # valid_lens -> SMEM
            grid=grid,
            in_specs=[
                pl.BlockSpec((batch_block, S, D), per_block),   # x (bf16)
                pl.BlockSpec((D, D), resident),                 # W_q (pre-scaled)
                pl.BlockSpec((D, D), resident),                 # W_k
                pl.BlockSpec((D, D), resident),                 # W_v
                pl.BlockSpec((D, D), resident),                 # W_o
                pl.BlockSpec((D, H), resident),                 # FFN W1
                pl.BlockSpec((1, H), resident),                 # FFN b1
                pl.BlockSpec((H, D), resident),                 # FFN W2
                pl.BlockSpec((1, D), resident),                 # FFN b2
                pl.BlockSpec((1, D), resident),                 # LN1 gamma
                pl.BlockSpec((1, D), resident),                 # LN1 beta
                pl.BlockSpec((1, D), resident),                 # LN2 gamma
                pl.BlockSpec((1, D), resident),                 # LN2 beta
            ],
            out_specs=pl.BlockSpec((batch_block, S, D), per_block),
        ),
        compiler_params=pltpu.CompilerParams(
            dimension_semantics=("parallel",),
            vmem_limit_bytes=32 * 1024 * 1024),
        cost_estimate=pl.CostEstimate(
            flops=flops, transcendentals=transcendentals,
            bytes_accessed=bytes_accessed),
        interpret=interpret,
    )(valid_lens.astype(jnp.int32), xc, wq, wk, wv, wo,
      w1, b1, w2, b2, g1, be1, g2, be2)
    return out


# ----------------------------- pure-JAX reference -----------------------------
def encoder_block_reference(x, valid_lens, params, *, num_heads, eps=1e-5):
    B, S, D = x.shape
    nh = num_heads
    dh = D // nh

    def split_heads(t):  # (B,S,D) -> (B*nh, S, dh), d2l transpose_qkv
        return t.reshape(B, S, nh, dh).transpose(0, 2, 1, 3).reshape(B * nh, S, dh)

    q = split_heads(x @ params["wq"])
    k = split_heads(x @ params["wk"])
    v = split_heads(x @ params["wv"])

    scores = jnp.einsum("bqd,bkd->bqk", q, k) / math.sqrt(dh)
    vl = jnp.repeat(valid_lens, nh)                       # repeat over heads
    key_ids = jnp.arange(S)[None, None, :]
    scores = jnp.where(key_ids < vl[:, None, None], scores, -1e6)
    attn = jax.nn.softmax(scores, axis=-1)                # dropout = identity
    out = jnp.einsum("bqk,bkd->bqd", attn, v)
    out = out.reshape(B, nh, S, dh).transpose(0, 2, 1, 3).reshape(B, S, D)
    attn_out = out @ params["wo"]

    def layer_norm(t, g, b):
        mu = jnp.mean(t, axis=-1, keepdims=True)
        var = jnp.mean((t - mu) ** 2, axis=-1, keepdims=True)
        return (t - mu) / jnp.sqrt(var + eps) * g + b

    y = layer_norm(attn_out + x, params["g1"], params["be1"])
    f = jnp.maximum(y @ params["w1"] + params["b1"], 0.0) @ params["w2"] + params["b2"]
    return layer_norm(f + y, params["g2"], params["be2"])


if __name__ == "__main__":
    # Small shapes consistent with the module: norm_shape == [num_hiddens] == [32],
    # ffn_hidden = 64, 4 heads.
    B, S = 2, 8
    D = 32          # num_hiddens == key/query/value size == LayerNorm feature size
    H_FFN = 64      # ffn_num_hiddens
    NUM_HEADS = 4
    valid_lens = jnp.array([3, 2], dtype=jnp.int32)

    key = jax.random.PRNGKey(0)
    ks = jax.random.split(key, 13)
    x = jax.random.normal(ks[0], (B, S, D), jnp.float32)

    def linear_init(k, fan_in, shape):  # PyTorch nn.Linear default init
        bound = 1.0 / math.sqrt(fan_in)
        return jax.random.uniform(k, shape, jnp.float32, -bound, bound)

    params = {
        # attention projections: (in, out) layout, use_bias=False (module default)
        "wq": linear_init(ks[1], D, (D, D)),
        "wk": linear_init(ks[2], D, (D, D)),
        "wv": linear_init(ks[3], D, (D, D)),
        "wo": linear_init(ks[4], D, (D, D)),
        # position-wise FFN
        "w1": linear_init(ks[5], D, (D, H_FFN)),
        "b1": linear_init(ks[6], D, (H_FFN,)),
        "w2": linear_init(ks[7], H_FFN, (H_FFN, D)),
        "b2": linear_init(ks[8], H_FFN, (D,)),
        # LayerNorm affine params (perturbed from 1/0 to exercise the path)
        "g1": 1.0 + 0.1 * jax.random.normal(ks[9], (D,), jnp.float32),
        "be1": 0.1 * jax.random.normal(ks[10], (D,), jnp.float32),
        "g2": 1.0 + 0.1 * jax.random.normal(ks[11], (D,), jnp.float32),
        "be2": 0.1 * jax.random.normal(ks[12], (D,), jnp.float32),
    }

    y = encoder_block(x, valid_lens, params, num_heads=NUM_HEADS)
    jax.block_until_ready(y)

    with jax.default_matmul_precision("highest"):
        ref = encoder_block_reference(x, valid_lens, params, num_heads=NUM_HEADS)

    assert y.shape == (B, S, D)
    assert bool(jnp.all(jnp.isfinite(y)))
    err = float(jnp.max(jnp.abs(y - ref)))
    # bf16 MXU operands (f32 accumulate) vs. f32 reference -> looser tolerance.
    assert err < 5e-2, f"max abs err = {err}"

    # TODO(synk): train-mode dropout (attention weights + AddNorm) is omitted;
    # it would need pltpu.prng_seed/prng_random_bits and a train flag.
    print("KERNEL_OK")
</pallas_src>

<mosaic_0001>
module attributes {stable_mosaic.version = 11 : i64} {
  func.func @_encoder_block_kernel(%arg0: i32, %arg1: memref<2xi32, #tpu.memory_space<smem>>, %arg2: memref<2x8x32xbf16, #tpu.memory_space<vmem>>, %arg3: memref<32x32xbf16, #tpu.memory_space<vmem>>, %arg4: memref<32x32xbf16, #tpu.memory_space<vmem>>, %arg5: memref<32x32xbf16, #tpu.memory_space<vmem>>, %arg6: memref<32x32xbf16, #tpu.memory_space<vmem>>, %arg7: memref<32x64xbf16, #tpu.memory_space<vmem>>, %arg8: memref<1x64xf32, #tpu.memory_space<vmem>>, %arg9: memref<64x32xbf16, #tpu.memory_space<vmem>>, %arg10: memref<1x32xf32, #tpu.memory_space<vmem>>, %arg11: memref<1x32xf32, #tpu.memory_space<vmem>>, %arg12: memref<1x32xf32, #tpu.memory_space<vmem>>, %arg13: memref<1x32xf32, #tpu.memory_space<vmem>>, %arg14: memref<1x32xf32, #tpu.memory_space<vmem>>, %arg15: memref<2x8x32xf32, #tpu.memory_space<vmem>>) attributes {dimension_semantics = [#tpu.dimension_semantics<parallel>], iteration_bounds = array<i64: 1>, scalar_prefetch = 1 : i64, scratch_operands = 0 : i64, tpu.core_type = #tpu.core_type<tc>, window_params = [{transform_indices = @transform_0, window_bounds = array<i64: 2, 8, 32>}, {pipeline_mode = #tpu.pipeline_mode<synchronous>, transform_indices = @transform_1, window_bounds = array<i64: 32, 32>}, {pipeline_mode = #tpu.pipeline_mode<synchronous>, transform_indices = @transform_2, window_bounds = array<i64: 32, 32>}, {pipeline_mode = #tpu.pipeline_mode<synchronous>, transform_indices = @transform_3, window_bounds = array<i64: 32, 32>}, {pipeline_mode = #tpu.pipeline_mode<synchronous>, transform_indices = @transform_4, window_bounds = array<i64: 32, 32>}, {pipeline_mode = #tpu.pipeline_mode<synchronous>, transform_indices = @transform_5, window_bounds = array<i64: 32, 64>}, {pipeline_mode = #tpu.pipeline_mode<synchronous>, transform_indices = @transform_6, window_bounds = array<i64: 1, 64>}, {pipeline_mode = #tpu.pipeline_mode<synchronous>, transform_indices = @transform_7, window_bounds = array<i64: 64, 32>}, {pipeline_mode = #tpu.pipeline_mode<synchronous>, transform_indices = @transform_8, window_bounds = array<i64: 1, 32>}, {pipeline_mode = #tpu.pipeline_mode<synchronous>, transform_indices = @transform_9, window_bounds = array<i64: 1, 32>}, {pipeline_mode = #tpu.pipeline_mode<synchronous>, transform_indices = @transform_10, window_bounds = array<i64: 1, 32>}, {pipeline_mode = #tpu.pipeline_mode<synchronous>, transform_indices = @transform_11, window_bounds = array<i64: 1, 32>}, {pipeline_mode = #tpu.pipeline_mode<synchronous>, transform_indices = @transform_12, window_bounds = array<i64: 1, 32>}, {transform_indices = @transform_13, window_bounds = array<i64: 2, 8, 32>}]} {
    %c2_i32 = arith.constant 2 : i32
    %0 = arith.muli %arg0, %c2_i32 : i32
    %c0 = arith.constant 0 : index
    %c0_0 = arith.constant 0 : index
    %c0_1 = arith.constant 0 : index
    %1 = vector.load %arg2[%c0, %c0_0, %c0_1] : memref<2x8x32xbf16, #tpu.memory_space<vmem>>, vector<2x8x32xbf16>
    %2 = vector.shape_cast %1 : vector<2x8x32xbf16> to vector<16x32xbf16>
    %3 = arith.extf %2 : vector<16x32xbf16> to vector<16x32xf32>
    %c0_2 = arith.constant 0 : index
    %c0_3 = arith.constant 0 : index
    %4 = vector.load %arg3[%c0_2, %c0_3] : memref<32x32xbf16, #tpu.memory_space<vmem>>, vector<32x32xbf16>
    %cst = arith.constant dense<0.000000e+00> : vector<16x32xf32>
    %5 = tpu.matmul %2, %4, %cst {dimension_numbers = #tpu.dot_dimension_numbers<[1], [0], [0], [1], [0, 0, 1, 1], [], []>} : vector<16x32xbf16>, vector<32x32xbf16>, vector<16x32xf32> -> vector<16x32xf32>
    %c0_4 = arith.constant 0 : index
    %c0_5 = arith.constant 0 : index
    %6 = vector.load %arg4[%c0_4, %c0_5] : memref<32x32xbf16, #tpu.memory_space<vmem>>, vector<32x32xbf16>
    %cst_6 = arith.constant dense<0.000000e+00> : vector<16x32xf32>
    %7 = tpu.matmul %2, %6, %cst_6 {dimension_numbers = #tpu.dot_dimension_numbers<[1], [0], [0], [1], [0, 0, 1, 1], [], []>} : vector<16x32xbf16>, vector<32x32xbf16>, vector<16x32xf32> -> vector<16x32xf32>
    %c0_7 = arith.constant 0 : index
    %c0_8 = arith.constant 0 : index
    %8 = vector.load %arg5[%c0_7, %c0_8] : memref<32x32xbf16, #tpu.memory_space<vmem>>, vector<32x32xbf16>
    %cst_9 = arith.constant dense<0.000000e+00> : vector<16x32xf32>
    %9 = tpu.matmul %2, %8, %cst_9 {dimension_numbers = #tpu.dot_dimension_numbers<[1], [0], [0], [1], [0, 0, 1, 1], [], []>} : vector<16x32xbf16>, vector<32x32xbf16>, vector<16x32xf32> -> vector<16x32xf32>
    %10 = tpu.iota {dimensions = array<i32: 1>} : vector<32x8xi32>
    %c0_i32 = arith.constant 0 : i32
    %11 = arith.addi %0, %c0_i32 : i32
    %12 = arith.index_cast %11 : i32 to index
    %13 = memref.load %arg1[%12] : memref<2xi32, #tpu.memory_space<smem>>
    %14 = vector.extract_strided_slice %5 {offsets = [0, 0], sizes = [8, 32], strides = [1, 1]} : vector<16x32xf32> to vector<8x32xf32>
    %15 = vector.extract_strided_slice %7 {offsets = [0, 0], sizes = [8, 32], strides = [1, 1]} : vector<16x32xf32> to vector<8x32xf32>
    %16 = vector.extract_strided_slice %14 {offsets = [0, 0], sizes = [8, 8], strides = [1, 1]} : vector<8x32xf32> to vector<8x8xf32>
    %17 = vector.extract_strided_slice %15 {offsets = [0, 0], sizes = [8, 8], strides = [1, 1]} : vector<8x32xf32> to vector<8x8xf32>
    %cst_10 = arith.constant dense<0.000000e+00> : vector<8x8xf32>
    %18 = tpu.matmul %16, %17, %cst_10 {dimension_numbers = #tpu.dot_dimension_numbers<[1], [1], [0], [0], [0, 0, 1, 0], [], []>} : vector<8x8xf32>, vector<8x8xf32>, vector<8x8xf32> -> vector<8x8xf32>
    %19 = vector.extract_strided_slice %14 {offsets = [0, 8], sizes = [8, 8], strides = [1, 1]} : vector<8x32xf32> to vector<8x8xf32>
    %20 = vector.extract_strided_slice %15 {offsets = [0, 8], sizes = [8, 8], strides = [1, 1]} : vector<8x32xf32> to vector<8x8xf32>
    %cst_11 = arith.constant dense<0.000000e+00> : vector<8x8xf32>
    %21 = tpu.matmul %19, %20, %cst_11 {dimension_numbers = #tpu.dot_dimension_numbers<[1], [1], [0], [0], [0, 0, 1, 0], [], []>} : vector<8x8xf32>, vector<8x8xf32>, vector<8x8xf32> -> vector<8x8xf32>
    %22 = vector.extract_strided_slice %14 {offsets = [0, 16], sizes = [8, 8], strides = [1, 1]} : vector<8x32xf32> to vector<8x8xf32>
    %23 = vector.extract_strided_slice %15 {offsets = [0, 16], sizes = [8, 8], strides = [1, 1]} : vector<8x32xf32> to vector<8x8xf32>
    %cst_12 = arith.constant dense<0.000000e+00> : vector<8x8xf32>
    %24 = tpu.matmul %22, %23, %cst_12 {dimension_numbers = #tpu.dot_dimension_numbers<[1], [1], [0], [0], [0, 0, 1, 0], [], []>} : vector<8x8xf32>, vector<8x8xf32>, vector<8x8xf32> -> vector<8x8xf32>
    %25 = vector.extract_strided_slice %14 {offsets = [0, 24], sizes = [8, 8], strides = [1, 1]} : vector<8x32xf32> to vector<8x8xf32>
    %26 = vector.extract_strided_slice %15 {offsets = [0, 24], sizes = [8, 8], strides = [1, 1]} : vector<8x32xf32> to vector<8x8xf32>
    %cst_13 = arith.constant dense<0.000000e+00> : vector<8x8xf32>
    %27 = tpu.matmul %25, %26, %cst_13 {dimension_numbers = #tpu.dot_dimension_numbers<[1], [1], [0], [0], [0, 0, 1, 0], [], []>} : vector<8x8xf32>, vector<8x8xf32>, vector<8x8xf32> -> vector<8x8xf32>
    %28 = tpu.concatenate %18, %21, %24, %27 in 0 : vector<8x8xf32>, vector<8x8xf32>, vector<8x8xf32>, vector<8x8xf32> -> vector<32x8xf32>
    %29 = vector.broadcast %13 : i32 to vector<32x8xi32>
    %30 = arith.cmpi slt, %10, %29 : vector<32x8xi32>
    %cst_14 = arith.constant -1.000000e+06 : f32
    %31 = vector.broadcast %cst_14 : f32 to vector<32x8xf32>
    %32 = arith.select %30, %28, %31 : vector<32x8xi1>, vector<32x8xf32>
    %c1_i32 = arith.constant 1 : i32
    %33 = arith.addi %0, %c1_i32 : i32
    %34 = arith.index_cast %33 : i32 to index
    %35 = memref.load %arg1[%34] : memref<2xi32, #tpu.memory_space<smem>>
    %36 = vector.extract_strided_slice %5 {offsets = [8, 0], sizes = [8, 32], strides = [1, 1]} : vector<16x32xf32> to vector<8x32xf32>
    %37 = vector.extract_strided_slice %7 {offsets = [8, 0], sizes = [8, 32], strides = [1, 1]} : vector<16x32xf32> to vector<8x32xf32>
    %38 = vector.extract_strided_slice %36 {offsets = [0, 0], sizes = [8, 8], strides = [1, 1]} : vector<8x32xf32> to vector<8x8xf32>
    %39 = vector.extract_strided_slice %37 {offsets = [0, 0], sizes = [8, 8], strides = [1, 1]} : vector<8x32xf32> to vector<8x8xf32>
    %cst_15 = arith.constant dense<0.000000e+00> : vector<8x8xf32>
    %40 = tpu.matmul %38, %39, %cst_15 {dimension_numbers = #tpu.dot_dimension_numbers<[1], [1], [0], [0], [0, 0, 1, 0], [], []>} : vector<8x8xf32>, vector<8x8xf32>, vector<8x8xf32> -> vector<8x8xf32>
    %41 = vector.extract_strided_slice %36 {offsets = [0, 8], sizes = [8, 8], strides = [1, 1]} : vector<8x32xf32> to vector<8x8xf32>
    %42 = vector.extract_strided_slice %37 {offsets = [0, 8], sizes = [8, 8], strides = [1, 1]} : vector<8x32xf32> to vector<8x8xf32>
    %cst_16 = arith.constant dense<0.000000e+00> : vector<8x8xf32>
    %43 = tpu.matmul %41, %42, %cst_16 {dimension_numbers = #tpu.dot_dimension_numbers<[1], [1], [0], [0], [0, 0, 1, 0], [], []>} : vector<8x8xf32>, vector<8x8xf32>, vector<8x8xf32> -> vector<8x8xf32>
    %44 = vector.extract_strided_slice %36 {offsets = [0, 16], sizes = [8, 8], strides = [1, 1]} : vector<8x32xf32> to vector<8x8xf32>
    %45 = vector.extract_strided_slice %37 {offsets = [0, 16], sizes = [8, 8], strides = [1, 1]} : vector<8x32xf32> to vector<8x8xf32>
    %cst_17 = arith.constant dense<0.000000e+00> : vector<8x8xf32>
    %46 = tpu.matmul %44, %45, %cst_17 {dimension_numbers = #tpu.dot_dimension_numbers<[1], [1], [0], [0], [0, 0, 1, 0], [], []>} : vector<8x8xf32>, vector<8x8xf32>, vector<8x8xf32> -> vector<8x8xf32>
    %47 = vector.extract_strided_slice %36 {offsets = [0, 24], sizes = [8, 8], strides = [1, 1]} : vector<8x32xf32> to vector<8x8xf32>
    %48 = vector.extract_strided_slice %37 {offsets = [0, 24], sizes = [8, 8], strides = [1, 1]} : vector<8x32xf32> to vector<8x8xf32>
    %cst_18 = arith.constant dense<0.000000e+00> : vector<8x8xf32>
    %49 = tpu.matmul %47, %48, %cst_18 {dimension_numbers = #tpu.dot_dimension_numbers<[1], [1], [0], [0], [0, 0, 1, 0], [], []>} : vector<8x8xf32>, vector<8x8xf32>, vector<8x8xf32> -> vector<8x8xf32>
    %50 = tpu.concatenate %40, %43, %46, %49 in 0 : vector<8x8xf32>, vector<8x8xf32>, vector<8x8xf32>, vector<8x8xf32> -> vector<32x8xf32>
    %51 = vector.broadcast %35 : i32 to vector<32x8xi32>
    %52 = arith.cmpi slt, %10, %51 : vector<32x8xi32>
    %cst_19 = arith.constant -1.000000e+06 : f32
    %53 = vector.broadcast %cst_19 : f32 to vector<32x8xf32>
    %54 = arith.select %52, %50, %53 : vector<32x8xi1>, vector<32x8xf32>
    %55 = tpu.concatenate %32, %54 in 0 : vector<32x8xf32>, vector<32x8xf32> -> vector<64x8xf32>
    %cst_20 = arith.constant dense<0xFF800000> : vector<64xf32>
    %56 = vector.multi_reduction <maximumf>, %55, %cst_20 [1] : vector<64x8xf32> to vector<64xf32>
    %57 = vector.shape_cast %56 : vector<64xf32> to vector<64x1xf32>
    %58 = vector.broadcast %57 : vector<64x1xf32> to vector<64x8xf32>
    %59 = arith.subf %55, %58 : vector<64x8xf32>
    %60 = math.exp %59 : vector<64x8xf32>
    %cst_21 = arith.constant dense<0.000000e+00> : vector<64xf32>
    %61 = vector.multi_reduction <add>, %60, %cst_21 [1] : vector<64x8xf32> to vector<64xf32>
    %62 = vector.shape_cast %61 : vector<64xf32> to vector<64x1xf32>
    %63 = tpu.reciprocal %62 {approx = true} : vector<64x1xf32> -> vector<64x1xf32>
    %64 = vector.broadcast %63 : vector<64x1xf32> to vector<64x8xf32>
    %65 = arith.mulf %60, %64 : vector<64x8xf32>
    %66 = vector.extract_strided_slice %9 {offsets = [0, 0], sizes = [8, 32], strides = [1, 1]} : vector<16x32xf32> to vector<8x32xf32>
    %67 = vector.extract_strided_slice %65 {offsets = [0, 0], sizes = [8, 8], strides = [1, 1]} : vector<64x8xf32> to vector<8x8xf32>
    %68 = vector.extract_strided_slice %66 {offsets = [0, 0], sizes = [8, 8], strides = [1, 1]} : vector<8x32xf32> to vector<8x8xf32>
    %cst_22 = arith.constant dense<0.000000e+00> : vector<8x8xf32>
    %69 = tpu.matmul %67, %68, %cst_22 {dimension_numbers = #tpu.dot_dimension_numbers<[1], [0], [0], [1], [0, 0, 1, 1], [], []>} : vector<8x8xf32>, vector<8x8xf32>, vector<8x8xf32> -> vector<8x8xf32>
    %70 = vector.extract_strided_slice %65 {offsets = [8, 0], sizes = [8, 8], strides = [1, 1]} : vector<64x8xf32> to vector<8x8xf32>
    %71 = vector.extract_strided_slice %66 {offsets = [0, 8], sizes = [8, 8], strides = [1, 1]} : vector<8x32xf32> to vector<8x8xf32>
    %cst_23 = arith.constant dense<0.000000e+00> : vector<8x8xf32>
    %72 = tpu.matmul %70, %71, %cst_23 {dimension_numbers = #tpu.dot_dimension_numbers<[1], [0], [0], [1], [0, 0, 1, 1], [], []>} : vector<8x8xf32>, vector<8x8xf32>, vector<8x8xf32> -> vector<8x8xf32>
    %73 = vector.extract_strided_slice %65 {offsets = [16, 0], sizes = [8, 8], strides = [1, 1]} : vector<64x8xf32> to vector<8x8xf32>
    %74 = vector.extract_strided_slice %66 {offsets = [0, 16], sizes = [8, 8], strides = [1, 1]} : vector<8x32xf32> to vector<8x8xf32>
    %cst_24 = arith.constant dense<0.000000e+00> : vector<8x8xf32>
    %75 = tpu.matmul %73, %74, %cst_24 {dimension_numbers = #tpu.dot_dimension_numbers<[1], [0], [0], [1], [0, 0, 1, 1], [], []>} : vector<8x8xf32>, vector<8x8xf32>, vector<8x8xf32> -> vector<8x8xf32>
    %76 = vector.extract_strided_slice %65 {offsets = [24, 0], sizes = [8, 8], strides = [1, 1]} : vector<64x8xf32> to vector<8x8xf32>
    %77 = vector.extract_strided_slice %66 {offsets = [0, 24], sizes = [8, 8], strides = [1, 1]} : vector<8x32xf32> to vector<8x8xf32>
    %cst_25 = arith.constant dense<0.000000e+00> : vector<8x8xf32>
    %78 = tpu.matmul %76, %77, %cst_25 {dimension_numbers = #tpu.dot_dimension_numbers<[1], [0], [0], [1], [0, 0, 1, 1], [], []>} : vector<8x8xf32>, vector<8x8xf32>, vector<8x8xf32> -> vector<8x8xf32>
    %79 = tpu.concatenate %69, %72, %75, %78 in 1 : vector<8x8xf32>, vector<8x8xf32>, vector<8x8xf32>, vector<8x8xf32> -> vector<8x32xf32>
    %80 = vector.extract_strided_slice %9 {offsets = [8, 0], sizes = [8, 32], strides = [1, 1]} : vector<16x32xf32> to vector<8x32xf32>
    %81 = vector.extract_strided_slice %65 {offsets = [32, 0], sizes = [8, 8], strides = [1, 1]} : vector<64x8xf32> to vector<8x8xf32>
    %82 = vector.extract_strided_slice %80 {offsets = [0, 0], sizes = [8, 8], strides = [1, 1]} : vector<8x32xf32> to vector<8x8xf32>
    %cst_26 = arith.constant dense<0.000000e+00> : vector<8x8xf32>
    %83 = tpu.matmul %81, %82, %cst_26 {dimension_numbers = #tpu.dot_dimension_numbers<[1], [0], [0], [1], [0, 0, 1, 1], [], []>} : vector<8x8xf32>, vector<8x8xf32>, vector<8x8xf32> -> vector<8x8xf32>
    %84 = vector.extract_strided_slice %65 {offsets = [40, 0], sizes = [8, 8], strides = [1, 1]} : vector<64x8xf32> to vector<8x8xf32>
    %85 = vector.extract_strided_slice %80 {offsets = [0, 8], sizes = [8, 8], strides = [1, 1]} : vector<8x32xf32> to vector<8x8xf32>
    %cst_27 = arith.constant dense<0.000000e+00> : vector<8x8xf32>
    %86 = tpu.matmul %84, %85, %cst_27 {dimension_numbers = #tpu.dot_dimension_numbers<[1], [0], [0], [1], [0, 0, 1, 1], [], []>} : vector<8x8xf32>, vector<8x8xf32>, vector<8x8xf32> -> vector<8x8xf32>
    %87 = vector.extract_strided_slice %65 {offsets = [48, 0], sizes = [8, 8], strides = [1, 1]} : vector<64x8xf32> to vector<8x8xf32>
    %88 = vector.extract_strided_slice %80 {offsets = [0, 16], sizes = [8, 8], strides = [1, 1]} : vector<8x32xf32> to vector<8x8xf32>
    %cst_28 = arith.constant dense<0.000000e+00> : vector<8x8xf32>
    %89 = tpu.matmul %87, %88, %cst_28 {dimension_numbers = #tpu.dot_dimension_numbers<[1], [0], [0], [1], [0, 0, 1, 1], [], []>} : vector<8x8xf32>, vector<8x8xf32>, vector<8x8xf32> -> vector<8x8xf32>
    %90 = vector.extract_strided_slice %65 {offsets = [56, 0], sizes = [8, 8], strides = [1, 1]} : vector<64x8xf32> to vector<8x8xf32>
    %91 = vector.extract_strided_slice %80 {offsets = [0, 24], sizes = [8, 8], strides = [1, 1]} : vector<8x32xf32> to vector<8x8xf32>
    %cst_29 = arith.constant dense<0.000000e+00> : vector<8x8xf32>
    %92 = tpu.matmul %90, %91, %cst_29 {dimension_numbers = #tpu.dot_dimension_numbers<[1], [0], [0], [1], [0, 0, 1, 1], [], []>} : vector<8x8xf32>, vector<8x8xf32>, vector<8x8xf32> -> vector<8x8xf32>
    %93 = tpu.concatenate %83, %86, %89, %92 in 1 : vector<8x8xf32>, vector<8x8xf32>, vector<8x8xf32>, vector<8x8xf32> -> vector<8x32xf32>
    %94 = tpu.concatenate %79, %93 in 0 : vector<8x32xf32>, vector<8x32xf32> -> vector<16x32xf32>
    %95 = arith.truncf %94 : vector<16x32xf32> to vector<16x32xbf16>
    %c0_30 = arith.constant 0 : index
    %c0_31 = arith.constant 0 : index
    %96 = vector.load %arg6[%c0_30, %c0_31] : memref<32x32xbf16, #tpu.memory_space<vmem>>, vector<32x32xbf16>
    %cst_32 = arith.constant dense<0.000000e+00> : vector<16x32xf32>
    %97 = tpu.matmul %95, %96, %cst_32 {dimension_numbers = #tpu.dot_dimension_numbers<[1], [0], [0], [1], [0, 0, 1, 1], [], []>} : vector<16x32xbf16>, vector<32x32xbf16>, vector<16x32xf32> -> vector<16x32xf32>
    %98 = arith.addf %97, %3 : vector<16x32xf32>
    %c0_33 = arith.constant 0 : index
    %c0_34 = arith.constant 0 : index
    %99 = vector.load %arg11[%c0_33, %c0_34] : memref<1x32xf32, #tpu.memory_space<vmem>>, vector<1x32xf32>
    %c0_35 = arith.constant 0 : index
    %c0_36 = arith.constant 0 : index
    %100 = vector.load %arg12[%c0_35, %c0_36] : memref<1x32xf32, #tpu.memory_space<vmem>>, vector<1x32xf32>
    %cst_37 = arith.constant dense<0.000000e+00> : vector<16xf32>
    %101 = vector.multi_reduction <add>, %98, %cst_37 [1] : vector<16x32xf32> to vector<16xf32>
    %102 = vector.shape_cast %101 : vector<16xf32> to vector<16x1xf32>
    %cst_38 = arith.constant 3.125000e-02 : f32
    %103 = vector.broadcast %cst_38 : f32 to vector<16x1xf32>
    %104 = arith.mulf %102, %103 : vector<16x1xf32>
    %105 = vector.broadcast %104 : vector<16x1xf32> to vector<16x32xf32>
    %106 = arith.subf %98, %105 : vector<16x32xf32>
    %107 = arith.mulf %106, %106 : vector<16x32xf32>
    %cst_39 = arith.constant dense<0.000000e+00> : vector<16xf32>
    %108 = vector.multi_reduction <add>, %107, %cst_39 [1] : vector<16x32xf32> to vector<16xf32>
    %109 = vector.shape_cast %108 : vector<16xf32> to vector<16x1xf32>
    %cst_40 = arith.constant 3.125000e-02 : f32
    %110 = vector.broadcast %cst_40 : f32 to vector<16x1xf32>
    %111 = arith.mulf %109, %110 : vector<16x1xf32>
    %cst_41 = arith.constant 9.99999974E-6 : f32
    %112 = vector.broadcast %cst_41 : f32 to vector<16x1xf32>
    %113 = arith.addf %111, %112 : vector<16x1xf32>
    %114 = math.rsqrt %113 : vector<16x1xf32>
    %115 = vector.broadcast %114 : vector<16x1xf32> to vector<16x32xf32>
    %116 = arith.mulf %106, %115 : vector<16x32xf32>
    %117 = vector.broadcast %99 : vector<1x32xf32> to vector<16x32xf32>
    %118 = arith.mulf %116, %117 : vector<16x32xf32>
    %119 = vector.broadcast %100 : vector<1x32xf32> to vector<16x32xf32>
    %120 = arith.addf %118, %119 : vector<16x32xf32>
    %121 = arith.truncf %120 : vector<16x32xf32> to vector<16x32xbf16>
    %c0_42 = arith.constant 0 : index
    %c0_43 = arith.constant 0 : index
    %122 = vector.load %arg7[%c0_42, %c0_43] : memref<32x64xbf16, #tpu.memory_space<vmem>>, vector<32x64xbf16>
    %cst_44 = arith.constant dense<0.000000e+00> : vector<16x64xf32>
    %123 = tpu.matmul %121, %122, %cst_44 {dimension_numbers = #tpu.dot_dimension_numbers<[1], [0], [0], [1], [0, 0, 1, 1], [], []>} : vector<16x32xbf16>, vector<32x64xbf16>, vector<16x64xf32> -> vector<16x64xf32>
    %c0_45 = arith.constant 0 : index
    %c0_46 = arith.constant 0 : index
    %124 = vector.load %arg8[%c0_45, %c0_46] : memref<1x64xf32, #tpu.memory_space<vmem>>, vector<1x64xf32>
    %125 = vector.broadcast %124 : vector<1x64xf32> to vector<16x64xf32>
    %126 = arith.addf %123, %125 : vector<16x64xf32>
    %cst_47 = arith.constant 0.000000e+00 : f32
    %127 = vector.broadcast %cst_47 : f32 to vector<16x64xf32>
    %128 = arith.maximumf %126, %127 : vector<16x64xf32>
    %129 = arith.truncf %128 : vector<16x64xf32> to vector<16x64xbf16>
    %c0_48 = arith.constant 0 : index
    %c0_49 = arith.constant 0 : index
    %130 = vector.load %arg9[%c0_48, %c0_49] : memref<64x32xbf16, #tpu.memory_space<vmem>>, vector<64x32xbf16>
    %cst_50 = arith.constant dense<0.000000e+00> : vector<16x32xf32>
    %131 = tpu.matmul %129, %130, %cst_50 {dimension_numbers = #tpu.dot_dimension_numbers<[1], [0], [0], [1], [0, 0, 1, 1], [], []>} : vector<16x64xbf16>, vector<64x32xbf16>, vector<16x32xf32> -> vector<16x32xf32>
    %c0_51 = arith.constant 0 : index
    %c0_52 = arith.constant 0 : index
    %132 = vector.load %arg10[%c0_51, %c0_52] : memref<1x32xf32, #tpu.memory_space<vmem>>, vector<1x32xf32>
    %133 = vector.broadcast %132 : vector<1x32xf32> to vector<16x32xf32>
    %134 = arith.addf %131, %133 : vector<16x32xf32>
    %135 = arith.addf %134, %120 : vector<16x32xf32>
    %c0_53 = arith.constant 0 : index
    %c0_54 = arith.constant 0 : index
    %136 = vector.load %arg13[%c0_53, %c0_54] : memref<1x32xf32, #tpu.memory_space<vmem>>, vector<1x32xf32>
    %c0_55 = arith.constant 0 : index
    %c0_56 = arith.constant 0 : index
    %137 = vector.load %arg14[%c0_55, %c0_56] : memref<1x32xf32, #tpu.memory_space<vmem>>, vector<1x32xf32>
    %cst_57 = arith.constant dense<0.000000e+00> : vector<16xf32>
    %138 = vector.multi_reduction <add>, %135, %cst_57 [1] : vector<16x32xf32> to vector<16xf32>
    %139 = vector.shape_cast %138 : vector<16xf32> to vector<16x1xf32>
    %cst_58 = arith.constant 3.125000e-02 : f32
    %140 = vector.broadcast %cst_58 : f32 to vector<16x1xf32>
    %141 = arith.mulf %139, %140 : vector<16x1xf32>
    %142 = vector.broadcast %141 : vector<16x1xf32> to vector<16x32xf32>
    %143 = arith.subf %135, %142 : vector<16x32xf32>
    %144 = arith.mulf %143, %143 : vector<16x32xf32>
    %cst_59 = arith.constant dense<0.000000e+00> : vector<16xf32>
    %145 = vector.multi_reduction <add>, %144, %cst_59 [1] : vector<16x32xf32> to vector<16xf32>
    %146 = vector.shape_cast %145 : vector<16xf32> to vector<16x1xf32>
    %cst_60 = arith.constant 3.125000e-02 : f32
    %147 = vector.broadcast %cst_60 : f32 to vector<16x1xf32>
    %148 = arith.mulf %146, %147 : vector<16x1xf32>
    %cst_61 = arith.constant 9.99999974E-6 : f32
    %149 = vector.broadcast %cst_61 : f32 to vector<16x1xf32>
    %150 = arith.addf %148, %149 : vector<16x1xf32>
    %151 = math.rsqrt %150 : vector<16x1xf32>
    %152 = vector.broadcast %151 : vector<16x1xf32> to vector<16x32xf32>
    %153 = arith.mulf %143, %152 : vector<16x32xf32>
    %154 = vector.broadcast %136 : vector<1x32xf32> to vector<16x32xf32>
    %155 = arith.mulf %153, %154 : vector<16x32xf32>
    %156 = vector.broadcast %137 : vector<1x32xf32> to vector<16x32xf32>
    %157 = arith.addf %155, %156 : vector<16x32xf32>
    %158 = vector.shape_cast %157 : vector<16x32xf32> to vector<2x8x32xf32>
    %c0_62 = arith.constant 0 : index
    %c0_63 = arith.constant 0 : index
    %c0_64 = arith.constant 0 : index
    %159 = vector.load %arg15[%c0_62, %c0_63, %c0_64] : memref<2x8x32xf32, #tpu.memory_space<vmem>>, vector<2x8x32xf32>
    tpu.vector_store %arg15[%c0_62, %c0_63, %c0_64], %158 {strides = array<i32>} : memref<2x8x32xf32, #tpu.memory_space<vmem>>, vector<2x8x32xf32>,
    return
  }
  func.func @transform_0(%arg0: i32, %arg1: memref<2xi32, #tpu.memory_space<smem>>) -> (i32, i32, i32) {
    %c0_i32 = arith.constant 0 : i32
    %c0_i32_0 = arith.constant 0 : i32
    %c0_i32_1 = arith.constant 0 : i32
    return %arg0, %c0_i32, %c0_i32_0 : i32, i32, i32
  }
  func.func @transform_1(%arg0: i32, %arg1: memref<2xi32, #tpu.memory_space<smem>>) -> (i32, i32) {
    %c0_i32 = arith.constant 0 : i32
    %c0_i32_0 = arith.constant 0 : i32
    %c0_i32_1 = arith.constant 0 : i32
    return %c0_i32, %c0_i32_0 : i32, i32
  }
  func.func @transform_2(%arg0: i32, %arg1: memref<2xi32, #tpu.memory_space<smem>>) -> (i32, i32) {
    %c0_i32 = arith.constant 0 : i32
    %c0_i32_0 = arith.constant 0 : i32
    %c0_i32_1 = arith.constant 0 : i32
    return %c0_i32, %c0_i32_0 : i32, i32
  }
  func.func @transform_3(%arg0: i32, %arg1: memref<2xi32, #tpu.memory_space<smem>>) -> (i32, i32) {
    %c0_i32 = arith.constant 0 : i32
    %c0_i32_0 = arith.constant 0 : i32
    %c0_i32_1 = arith.constant 0 : i32
    return %c0_i32, %c0_i32_0 : i32, i32
  }
  func.func @transform_4(%arg0: i32, %arg1: memref<2xi32, #tpu.memory_space<smem>>) -> (i32, i32) {
    %c0_i32 = arith.constant 0 : i32
    %c0_i32_0 = arith.constant 0 : i32
    %c0_i32_1 = arith.constant 0 : i32
    return %c0_i32, %c0_i32_0 : i32, i32
  }
  func.func @transform_5(%arg0: i32, %arg1: memref<2xi32, #tpu.memory_space<smem>>) -> (i32, i32) {
    %c0_i32 = arith.constant 0 : i32
    %c0_i32_0 = arith.constant 0 : i32
    %c0_i32_1 = arith.constant 0 : i32
    return %c0_i32, %c0_i32_0 : i32, i32
  }
  func.func @transform_6(%arg0: i32, %arg1: memref<2xi32, #tpu.memory_space<smem>>) -> (i32, i32) {
    %c0_i32 = arith.constant 0 : i32
    %c0_i32_0 = arith.constant 0 : i32
    %c0_i32_1 = arith.constant 0 : i32
    return %c0_i32, %c0_i32_0 : i32, i32
  }
  func.func @transform_7(%arg0: i32, %arg1: memref<2xi32, #tpu.memory_space<smem>>) -> (i32, i32) {
    %c0_i32 = arith.constant 0 : i32
    %c0_i32_0 = arith.constant 0 : i32
    %c0_i32_1 = arith.constant 0 : i32
    return %c0_i32, %c0_i32_0 : i32, i32
  }
  func.func @transform_8(%arg0: i32, %arg1: memref<2xi32, #tpu.memory_space<smem>>) -> (i32, i32) {
    %c0_i32 = arith.constant 0 : i32
    %c0_i32_0 = arith.constant 0 : i32
    %c0_i32_1 = arith.constant 0 : i32
    return %c0_i32, %c0_i32_0 : i32, i32
  }
  func.func @transform_9(%arg0: i32, %arg1: memref<2xi32, #tpu.memory_space<smem>>) -> (i32, i32) {
    %c0_i32 = arith.constant 0 : i32
    %c0_i32_0 = arith.constant 0 : i32
    %c0_i32_1 = arith.constant 0 : i32
    return %c0_i32, %c0_i32_0 : i32, i32
  }
  func.func @transform_10(%arg0: i32, %arg1: memref<2xi32, #tpu.memory_space<smem>>) -> (i32, i32) {
    %c0_i32 = arith.constant 0 : i32
    %c0_i32_0 = arith.constant 0 : i32
    %c0_i32_1 = arith.constant 0 : i32
    return %c0_i32, %c0_i32_0 : i32, i32
  }
  func.func @transform_11(%arg0: i32, %arg1: memref<2xi32, #tpu.memory_space<smem>>) -> (i32, i32) {
    %c0_i32 = arith.constant 0 : i32
    %c0_i32_0 = arith.constant 0 : i32
    %c0_i32_1 = arith.constant 0 : i32
    return %c0_i32, %c0_i32_0 : i32, i32
  }
  func.func @transform_12(%arg0: i32, %arg1: memref<2xi32, #tpu.memory_space<smem>>) -> (i32, i32) {
    %c0_i32 = arith.constant 0 : i32
    %c0_i32_0 = arith.constant 0 : i32
    %c0_i32_1 = arith.constant 0 : i32
    return %c0_i32, %c0_i32_0 : i32, i32
  }
  func.func @transform_13(%arg0: i32, %arg1: memref<2xi32, #tpu.memory_space<smem>>) -> (i32, i32, i32) {
    %c0_i32 = arith.constant 0 : i32
    %c0_i32_0 = arith.constant 0 : i32
    %c0_i32_1 = arith.constant 0 : i32
    return %arg0, %c0_i32, %c0_i32_0 : i32, i32, i32
  }
}

</mosaic_0001>

<bundles_post_ra>
// kernel: tpu_custom_call.1
= control target key start
LH: loop header
LB: loop body
LE: loop exit
PB: predicated region body
PF: predicated region fallthrough
CT: control target
= control target key end

     0   :  { %s2811_s0 = inlined_call_operand.hbm [shape: s32[2], index: 0, kind: input, shape index: {}]   ;;  %s2812_s1 = inlined_call_operand.hbm [shape: bf16[2,8,32], index: 1, kind: input, shape index: {}]   ;;  %s2813_s2 = inlined_call_operand.vmem [shape: bf16[32,32], index: 2, kind: input, shape index: {}]   ;;  %s2814_s3 = inlined_call_operand.vmem [shape: bf16[32,32], index: 3, kind: input, shape index: {}]   ;;  %s2815_s4 = inlined_call_operand.vmem [shape: bf16[32,32], index: 4, kind: input, shape index: {}]   ;;  %s2816_s5 = inlined_call_operand.hbm [shape: bf16[32,32], index: 5, kind: input, shape index: {}]   ;;  %s2817_s6 = inlined_call_operand.hbm [shape: bf16[32,64], index: 6, kind: input, shape index: {}]   ;;  %s2818_s7 = inlined_call_operand.vmem [shape: f32[1,64], index: 7, kind: input, shape index: {}]   ;;  %s2819_s8 = inlined_call_operand.vmem [shape: bf16[64,32], index: 8, kind: input, shape index: {}]   ;;  %s2820_s9 = inlined_call_operand.vmem [shape: f32[1,32], index: 9, kind: input, shape index: {}]   ;;  %s2821_s10 = inlined_call_operand.vmem [shape: f32[1,32], index: 10, kind: input, shape index: {}]   ;;  %s2822_s11 = inlined_call_operand.vmem [shape: f32[1,32], index: 11, kind: input, shape index: {}]   ;;  %s2823_s12 = inlined_call_operand.vmem [shape: f32[1,32], index: 12, kind: input, shape index: {}]   ;;  %s2824_s13 = inlined_call_operand.vmem [shape: f32[1,32], index: 13, kind: input, shape index: {}]   ;;  %s2825_s14 = inlined_call_operand.hbm [shape: f32[2,8,32], index: 14, kind: output, shape index: {}]  }
   0x1   :  { %s2288_s15 = scalar_lea.hbm %s2811_s0, 16 }
   0x2   :  { %p2289_p0 = scmp.ne.s32.totalorder %s2811_s0, %s2288_s15  ;;  %p2292_p1 = scmp.lt.u32.totalorder %s2288_s15, %s2811_s0 }
   0x4   :  { %p2294_p2 = pnand %p2292_p1, %p2289_p0 }
   0x6   :  { %2297 = shalt.err (!%p2294_p2)  }
   0x7   :  { %s2394_s20 = smov [#allocation3]  }
   0x8   :  { %20 = dma.hbm_to_smem %s2811_s0, 16, %s2394_s20, [#allocation2] }
   0x9   :  { %2386 = dma.done.wait [#allocation2], 16 }
   0xa   :  { %2387 = vsyncadd [#allocation2], 4294967280 }
   0xb   :  { %22 = sfence }
   0xc   :  { %23 = vsyncpa [#allocation5], 0 }
   0xd   :  { %24 = vsyncpa [#allocation8], 0 }
   0xe   :  { %25 = vsyncpa [#allocation6], 0  ;;  %s2395_s23 = smov [#allocation7]   ;;  %s2396_s25 = smov [#allocation4]  }
   0xf   :  { %s49_s24 = sshll.u32 %s2395_s23, 4  ;;  %s31_s26 = sshll.u32 %s2396_s25, 4  ;;  %s50_s24 = int_to_ptr.vmem [resolvable:$true] %s49_s24  ;;  %s2497_s26 = int_to_ptr.vmem [resolvable:$true] %s31_s26 }
  0x10   :  { %s2298_s29 = scalar_lea.hbm %s2816_s5, 256 }
  0x11   :  { %p2299_p3 = scmp.ne.s32.totalorder %s2816_s5, %s2298_s29  ;;  %p2302_p4 = scmp.lt.u32.totalorder %s2298_s29, %s2816_s5 }
  0x13   :  { %p2304_p5 = pnand %p2302_p4, %p2299_p3 }
  0x15   :  { %2307 = shalt.err (!%p2304_p5)
}
  0x16   :  { %s2308_s17 = scalar_lea.vmem %s50_s24, 256  ;;  %p2313_p7 = scmp.lt.s32.totalorder %s50_s24, %s50_s24 }
  0x17   :  { %p2309_p6 = scmp.ne.s32.totalorder %s50_s24, %s2308_s17  ;;  %p2314_p8 = scmp.lt.s32.totalorder %s2308_s17, %s2308_s17 }
  0x19   :  { %p2315_p9 = por %p2314_p8, %p2313_p7 }
  0x1b   :  { %p2316_p10 = pnand %p2315_p9, %p2309_p6 }
  0x1d   :  { %2319 = shalt.err (!%p2316_p10)
}
  0x1e   :  { %s2397_s18 = smov 64   ;;  %s2398_s19 = smov 4  }
  0x1f   :  { %55 = dma.hbm_to_vmem [thread:$0]  %s2816_s5, 256, %s50_s24, [#allocation8], %s2397_s18, %s2397_s18, %s2398_s19  }
  0x20   :  { %s2320_s25 = scalar_lea.hbm %s2812_s1, 128 }
  0x21   :  { %p2321_p11 = scmp.ne.s32.totalorder %s2812_s1, %s2320_s25  ;;  %p2324_p12 = scmp.lt.u32.totalorder %s2320_s25, %s2812_s1 }
  0x23   :  { %p2326_p13 = pnand %p2324_p12, %p2321_p11 }
  0x25   :  { %2329 = shalt.err (!%p2326_p13)
}
  0x26   :  { %s2330_s15 = scalar_lea.vmem %s2497_s26, 128  ;;  %p2335_p1 = scmp.lt.s32.totalorder %s2497_s26, %s2497_s26 }
  0x27   :  { %p2331_p0 = scmp.ne.s32.totalorder %s2497_s26, %s2330_s15  ;;  %p2336_p2 = scmp.lt.s32.totalorder %s2330_s15, %s2330_s15 }
  0x29   :  { %p2337_p3 = por %p2336_p2, %p2335_p1 }
  0x2b   :  { %p2338_p4 = pnand %p2337_p3, %p2331_p0 }
  0x2d   :  { %2341 = shalt.err (!%p2338_p4)
}
  0x2e   :  { %37 = dma.hbm_to_vmem [thread:$0]  %s2812_s1, 128, %s2497_s26, [#allocation5], %s2397_s18, %s2397_s18, %s2398_s19  }
  0x2f   :  { %s2399_s0 = smov [#allocation9]   ;;  %s2342_s21 = scalar_lea.hbm %s2817_s6, 256 }
  0x30   :  { %s61_s16 = sshll.u32 %s2399_s0, 4  ;;  %p2343_p5 = scmp.ne.s32.totalorder %s2817_s6, %s2342_s21  ;;  %s62_s16 = int_to_ptr.vmem [resolvable:$true] %s61_s16 }
  0x31   :  { %p2346_p6 = scmp.lt.u32.totalorder %s2342_s21, %s2817_s6 }
  0x33   :  { %p2348_p7 = pnand %p2346_p6, %p2343_p5 }
  0x35   :  { %2351 = shalt.err (!%p2348_p7)
}
  0x36   :  { %s2352_s28 = scalar_lea.vmem %s62_s16, 256  ;;  %p2357_p9 = scmp.lt.s32.totalorder %s62_s16, %s62_s16 }
  0x37   :  { %p2353_p8 = scmp.ne.s32.totalorder %s62_s16, %s2352_s28  ;;  %p2358_p10 = scmp.lt.s32.totalorder %s2352_s28, %s2352_s28 }
  0x39   :  { %p2359_p11 = por %p2358_p10, %p2357_p9 }
  0x3b   :  { %p2360_p12 = pnand %p2359_p11, %p2353_p8 }
  0x3d   :  { %2363 = shalt.err (!%p2360_p12)
}
  0x3e   :  { %67 = dma.hbm_to_vmem [thread:$0]  %s2817_s6, 256, %s62_s16, [#allocation8], %s2397_s18, %s2397_s18, %s2398_s19  }
  0x3f   :  { %2388 = dma.done.wait [#allocation5], 128  }
  0x40   :  { %2389 = vsyncadd [#allocation5], 4294967168 }
  0x41   :  { %2390 = dma.done.wait [#allocation8], 512  }
  0x42   :  { %2391 = vsyncadd [#allocation8], 4294966784  ;;  %v2400_v0 = vmov 0.0   ;;  %vm2401_vm0 = vmmov 0   ;;  %v2232_v1 = vld [vmem:[%s2813_s2] sm:$0xff]   ;;  %v2233_v2 = vld [vmem:[%s2813_s2 + $0x8] sm:$0xff]   ;;  %v277_v32 = vlaneseq }
  0x43   :  { %2069 = vmatprep.subr.bf16.mxu1 %v2400_v0  ;;  %2073 = vmatprep.mubr.msk.bf16.mxu1 %vm2401_vm0, %v2400_v0  ;;  %v2561_v3 = vld [vmem:[#allocation4] sm:$0xff]   ;;  %vm118_vm1 = vcmask 261120   ;;  %v2236_v5 = vld [vmem:[%s2814_s3 + $0x8] sm:$0xff]   ;;  %s2402_s17 = smov 104   ;;  %s2403_s20 = smov 120   ;;  %vm280_vm2 = vcmask 64512  }
  0x44   :  { %2085 = vmatprep.subr.bf16.mxu0 %v2400_v0  ;;  %2089 = vmatprep.mubr.msk.bf16.mxu0 %vm2401_vm0, %v2400_v0  ;;  %v2235_v4 = vld [vmem:[%s2814_s3] sm:$0xff]   ;;  %v2238_v7 = vld [vmem:[%s2815_s4 + $0x8] sm:$0xff]   ;;  %s279_s21 = sld [smem:[#allocation3]]  ;;  %v278_v33 = vand.u32 127, %v277_v32  ;;  %s1983_s22 = sld [smem:[#allocation3 + $0x1]]  ;;  %vm1318_vm5 = vcmask 130048  }
  0x45   :  { %2070 = vmatpush3.bf16.msra.mxu1 %v2232_v1  ;;  %v2237_v6 = vld [vmem:[%s2815_s4] sm:$0xff]   ;;  %s2404_s4 = smov 112   ;;  %s2405_s23 = smov 8   ;;  %vm1320_vm6 = vcmask 195584   ;;  %vm1854_vm7 = vcmask 523264  }
  0x46   :  { %2071 = vmatprep.subr.bf16.mxu1 %v2400_v0  ;;  %2086 = vmatpush3.bf16.msra.mxu0 %v2237_v6  ;;  %s2406_s25 = smov 16   ;;  %s2407_s27 = smov 24  }
  0x47   :  { %2087 = vmatprep.subr.bf16.mxu0 %v2400_v0 }
  0x49   :  { %2072 = vmatpush3.bf16.msra.mxu1 %v2233_v2 }
  0x4a   :  { %2077 = vmatprep.subr.bf16.mxu1 %v2400_v0  ;;  %2088 = vmatpush3.bf16.msra.mxu0 %v2238_v7  ;;  %v591_v34 = vstv %s279_s21  ;;  %v909_v43 = vstv %s1983_s22 }
  0x4b   :  { %2103 = vmatprep.subr.mxu0 %v2400_v0  ;;  %vm2651_vm3 = vcmp.lt.s32.totalorder %v278_v33, %v591_v34  ;;  %vm2664_vm4 = vcmp.lt.s32.totalorder %v278_v33, %v909_v43 }
  0x4c   :  { %2074 = vmatmul.mubr.msk.bf16.vlgmr.msra.gmra.mrb[0].mxu1 %vm118_vm1, %v2561_v3 }
  0x4d   :  { %2078 = vmatpush3.bf16.msra.mxu1 %v2235_v4  ;;  %2081 = vmatprep.mubr.msk.bf16.mxu1 %vm2401_vm0, %v2400_v0 }
  0x4e   :  { %2079 = vmatprep.subr.bf16.mxu1 %v2400_v0  ;;  %2090 = vmatmul.mubr.msk.bf16.vlgmr.msra.gmra.mrb[0].mxu0 %vm118_vm1, %v2561_v3 }
  0x4f   :  { %2105 = vmatprep.mubr.msk.f32.mxu0 %vm2401_vm0, %v2400_v0 }
  0x51   :  { %2080 = vmatpush3.bf16.msra.mxu1 %v2236_v5 }
  0x52   :  { %2093 = vmatprep.subr.mxu1 %v2400_v0 }
  0x54   :  { %2082 = vmatmul.mubr.msk.bf16.vlgmr.msra.gmra.mrb[4].mxu1 %vm118_vm1, %v2561_v3 }
  0x55   :  { %2095 = vmatprep.mubr.msk.f32.mxu1 %vm2401_vm0, %v2400_v0 }
 0x11f   :  { %v156_v8 = vpop.f32.mrb[0].mxu1 }
 0x120   :  { %513 = vrot.lane.b32.xlu1 %v156_v8, %s2402_s17  ;;  %357 = vrot.lane.b32.xlu0 %v156_v8, %s2403_s20  ;;  %v2075_v9 = vpop.f32.mrb[1].mxu1 }
 0x121   :  { %v159_v10 = vpop.f32.mrb[2].mxu1  ;;  %v2610_v17 = vpop.f32.mrb[0].mxu0 }
 0x122   :  { %v2076_v11 = vpop.f32.mrb[3].mxu1  ;;  %v2091_v19 = vpop.f32.mrb[1].mxu0 }
 0x123   :  { %v2612_v20 = vpop.f32.mrb[2].mxu0 }
 0x124   :  { %v2092_v21 = vpop.f32.mrb[3].mxu0 }
 0x127   :  { %v213_v12 = vpop.f32.mrb[4].mxu1 }
 0x128   :  { %437 = vrot.lane.b32.xlu1 %v213_v12, %s2404_s4  ;;  %359 = vrot.lane.b32.xlu0 %v213_v12, %s2403_s20  ;;  %v2083_v13 = vpop.f32.mrb[5].mxu1 }
 0x129   :  { %2094 = vmatpush3.xpose.msk.msra.mxu1 %vm280_vm2, %v213_v12  ;;  %v216_v14 = vpop.f32.mrb[6].mxu1 }
 0x12a   :  { %v2084_v15 = vpop.f32.mrb[7].mxu1  ;;  %2098 = vmatprep.subr.mxu1 %v2400_v0 }
 0x12c   :  { %2096 = vmatmul.mubr.msk.f32.vlgmr.msra.gmra.mrb[8].mxu1 %vm280_vm2, %v156_v8  ;;  %515 = vrot.lane.b32.xlu1 %v213_v12, %s2402_s17 }
 0x12d   :  { %435 = vrot.lane.b32.xlu0 %v156_v8, %s2404_s4  ;;  %2100 = vmatprep.mubr.msk.f32.mxu1 %vm2401_vm0, %v2400_v0 }
 0x130   :  { %675 = vrot.lane.b32.xlu1 %v159_v10, %s2403_s20 }
 0x131   :  { %677 = vrot.lane.b32.xlu0 %v216_v14, %s2403_s20 }
 0x134   :  { %833 = vrot.lane.b32.xlu1 %v216_v14, %s2402_s17 }
 0x135   :  { %755 = vrot.lane.b32.xlu0 %v216_v14, %s2404_s4 }
 0x138   :  { %831 = vrot.lane.b32.xlu1 %v159_v10, %s2402_s17 }
 0x139   :  { %753 = vrot.lane.b32.xlu0 %v159_v10, %s2404_s4 }
 0x192   :  { %v514_v16 = vpop.permute.xlu1 %513  ;;  %v358_v18 = vpop.permute.xlu0 %357 }
 0x19a   :  { %v438_v22 = vpop.permute.xlu1 %437  ;;  %v360_v23 = vpop.permute.xlu0 %359 }
 0x19b   :  { %2099 = vmatpush3.xpose.msk.msra.mxu1 %vm280_vm2, %v360_v23  ;;  %2104 = vmatpush3.xpose.msk.msra.mxu0 %vm280_vm2, %v438_v22 }
 0x19c   :  { %2113 = vmatprep.subr.mxu0 %v2400_v0  ;;  %2108 = vmatprep.subr.mxu1 %v2400_v0 }
 0x19e   :  { %v516_v24 = vpop.permute.xlu1 %515  ;;  %2101 = vmatmul.mubr.msk.f32.vlgmr.msra.gmra.mrb[10].mxu1 %vm280_vm2, %v358_v18 }
 0x19f   :  { %v436_v25 = vpop.permute.xlu0 %435  ;;  %2109 = vmatpush3.xpose.msk.msra.mxu1 %vm280_vm2, %v516_v24  ;;  %2110 = vmatprep.mubr.msk.f32.mxu1 %vm2401_vm0, %v2400_v0 }
 0x1a0   :  { %2106 = vmatmul.mubr.msk.f32.vlgmr.msra.gmra.mrb[4].mxu0 %vm280_vm2, %v436_v25  ;;  %2118 = vmatprep.subr.mxu1 %v2400_v0 }
 0x1a1   :  { %2114 = vmatpush3.xpose.msk.msra.mxu0 %vm280_vm2, %v216_v14  ;;  %2115 = vmatprep.mubr.msk.f32.mxu0 %vm2401_vm0, %v2400_v0 }
 0x1a2   :  { %v676_v26 = vpop.permute.xlu1 %675  ;;  %2111 = vmatmul.mubr.msk.f32.vlgmr.msra.gmra.mrb[12].mxu1 %vm280_vm2, %v514_v16  ;;  %2123 = vmatprep.subr.mxu0 %v2400_v0 }
 0x1a3   :  { %v678_v27 = vpop.permute.xlu0 %677  ;;  %2120 = vmatprep.mubr.msk.f32.mxu1 %vm2401_vm0, %v2400_v0 }
 0x1a4   :  { %2116 = vmatmul.mubr.msk.f32.vlgmr.msra.gmra.mrb[6].mxu0 %vm280_vm2, %v159_v10  ;;  %2119 = vmatpush3.xpose.msk.msra.mxu1 %vm280_vm2, %v678_v27 }
 0x1a5   :  { %2128 = vmatprep.subr.mxu1 %v2400_v0  ;;  %2125 = vmatprep.mubr.msk.f32.mxu0 %vm2401_vm0, %v2400_v0 }
 0x1a6   :  { %v834_v28 = vpop.permute.xlu1 %833 }
 0x1a7   :  { %2121 = vmatmul.mubr.msk.f32.vlgmr.msra.gmra.mrb[14].mxu1 %vm280_vm2, %v676_v26  ;;  %v756_v29 = vpop.permute.xlu0 %755 }
 0x1a8   :  { %2124 = vmatpush3.xpose.msk.msra.mxu0 %vm280_vm2, %v756_v29  ;;  %2129 = vmatpush3.xpose.msk.msra.mxu1 %vm280_vm2, %v834_v28 }
 0x1a9   :  { %2130 = vmatprep.mubr.msk.f32.mxu1 %vm2401_vm0, %v2400_v0  ;;  %2133 = vmatprep.subr.mxu0 %v2400_v0 }
 0x1aa   :  { %v832_v30 = vpop.permute.xlu1 %831  ;;  %2138 = vmatprep.subr.mxu1 %v2400_v0 }
 0x1ab   :  { %v754_v31 = vpop.permute.xlu0 %753  ;;  %2131 = vmatmul.mubr.msk.f32.vlgmr.msra.gmra.mrb[16].mxu1 %vm280_vm2, %v832_v30 }
 0x1ac   :  { %2126 = vmatmul.mubr.msk.f32.vlgmr.msra.gmra.mrb[8].mxu0 %vm280_vm2, %v754_v31  ;;  %2140 = vmatprep.mubr.msk.f32.mxu1 %vm2401_vm0, %v2400_v0 }
 0x1ad   :  { %2134 = vmatpush3.msra.mxu0 %v2610_v17  ;;  %2135 = vmatprep.mubr.msk.f32.mxu0 %vm2401_vm0, %v2400_v0 }
 0x1ae   :  { %2143 = vmatprep.subr.mxu0 %v2400_v0 }
 0x1ff   :  { %v353_v36 = vpop.f32.mrb[8].mxu1 }
 0x200   :  { %v593_v37 = vsel %vm2651_vm3, %v353_v36, -1000000.0  ;;  %v2097_v38 = vpop.f32.mrb[9].mxu1 }
 0x201   :  { %v915_v39 = vsel %vm280_vm2, %v593_v37, -inf }
 0x202   :  { %916 = vmax.xlane.f32.xlu0 %v915_v39 }
 0x271   :  { %v431_v40 = vpop.f32.mrb[10].mxu1 }
 0x272   :  { %v594_v41 = vsel %vm2651_vm3, %v431_v40, -1000000.0  ;;  %v2102_v42 = vpop.f32.mrb[11].mxu1 }
 0x273   :  { %v509_v44 = vpop.f32.mrb[4].mxu0  ;;  %v918_v45 = vsel %vm280_vm2, %v594_v41, -inf }
 0x274   :  { %v595_v46 = vsel %vm2651_vm3, %v509_v44, -1000000.0  ;;  %v2107_v47 = vpop.f32.mrb[5].mxu0  ;;  %919 = vmax.xlane.f32.xlu1 %v918_v45 }
 0x275   :  { %v921_v48 = vsel %vm280_vm2, %v595_v46, -inf  ;;  %v587_v49 = vpop.f32.mrb[12].mxu1 }
 0x276   :  { %922 = vmax.xlane.f32.xlu0 %v921_v48  ;;  %v596_v51 = vsel %vm2651_vm3, %v587_v49, -1000000.0  ;;  %v2112_v52 = vpop.f32.mrb[13].mxu1 }
 0x277   :  { %v671_v53 = vpop.f32.mrb[6].mxu0  ;;  %v924_v54 = vsel %vm280_vm2, %v596_v51, -inf }
 0x278   :  { %v911_v55 = vsel %vm2664_vm4, %v671_v53, -1000000.0  ;;  %v2117_v56 = vpop.f32.mrb[7].mxu0 }
 0x279   :  { %v927_v57 = vsel %vm280_vm2, %v911_v55, -inf }
 0x27a   :  { %928 = vmax.xlane.f32.xlu1 %v927_v57  ;;  %925 = vmax.xlane.f32.xlu0 %v924_v54  ;;  %v749_v58 = vpop.f32.mrb[14].mxu1 }
 0x27b   :  { %v912_v59 = vsel %vm2664_vm4, %v749_v58, -1000000.0  ;;  %v2122_v60 = vpop.f32.mrb[15].mxu1 }
 0x27c   :  { %v930_v61 = vsel %vm280_vm2, %v912_v59, -inf }
 0x27e   :  { %931 = vmax.xlane.f32.xlu0 %v930_v61  ;;  %v905_v62 = vpop.f32.mrb[16].mxu1 }
 0x27f   :  { %v827_v63 = vpop.f32.mrb[8].mxu0  ;;  %v914_v1 = vsel %vm2664_vm4, %v905_v62, -1000000.0  ;;  %v2132_v2 = vpop.f32.mrb[17].mxu1 }
 0x280   :  { %v913_v4 = vsel %vm2664_vm4, %v827_v63, -1000000.0  ;;  %v2127_v5 = vpop.f32.mrb[9].mxu0  ;;  %v936_v6 = vsel %vm280_vm2, %v914_v1, -inf }
 0x281   :  { %v933_v7 = vsel %vm280_vm2, %v913_v4, -inf }
 0x282   :  { %934 = vmax.xlane.f32.xlu1 %v933_v7  ;;  %937 = vmax.xlane.f32.xlu0 %v936_v6 }
 0x28f   :  { %v917_v8 = vpop.xlane.xlu0 %916 }
 0x290   :  { %v939_v9 = vsub.f32 %v593_v37, %v917_v8 }
 0x292   :  { %v947_v10 = vmul.f32 1.442695, %v939_v9 }
 0x293   :  { %1077 = vrot.lane.b32.xlu1 %v2610_v17, %s2403_s20 }
 0x294   :  { %2248 = vpow2.f32 %v947_v10 }
 0x297   :  { %1229 = vrot.lane.b32.xlu1 %v2610_v17, %s2402_s17 }
 0x298   :  { %1153 = vrot.lane.b32.xlu0 %v2610_v17, %s2404_s4 }
 0x29b   :  { %1396 = vrot.lane.b32.xlu1 %v2612_v20, %s2403_s20 }
 0x29e   :  { %v2249_v11 = vpop.eup %2248 }
 0x29f   :  { %v963_v12 = vsel %vm280_vm2, %v2249_v11, 0.0 }
 0x2bf   :  { %964 = vadd.xlane.f32.xlu1 %v963_v12 }
 0x301   :  { %v920_v13 = vpop.xlane.xlu1 %919 }
 0x302   :  { %v940_v14 = vsub.f32 %v594_v41, %v920_v13 }
 0x303   :  { %v923_v15 = vpop.xlane.xlu0 %922 }
 0x304   :  { %v949_v16 = vmul.f32 1.442695, %v940_v14  ;;  %v941_v18 = vsub.f32 %v595_v46, %v923_v15 }
 0x306   :  { %2250 = vpow2.f32 %v949_v16  ;;  %v951_v19 = vmul.f32 1.442695, %v941_v18 }
 0x307   :  { %v929_v21 = vpop.xlane.xlu1 %928  ;;  %v926_v17 = vpop.xlane.xlu0 %925 }
 0x308   :  { %2252 = vpow2.f32 %v951_v19  ;;  %v943_v22 = vsub.f32 %v911_v55, %v929_v21  ;;  %v942_v23 = vsub.f32 %v596_v51, %v926_v17 }
 0x30a   :  { %v955_v24 = vmul.f32 1.442695, %v943_v22  ;;  %v953_v25 = vmul.f32 1.442695, %v942_v23  ;;  %v2239_v23 = vld [vmem:[#allocation7] sm:$0xff]  }
 0x30b   :  { %v932_v26 = vpop.xlane.xlu0 %931 }
 0x30c   :  { %2254 = vpow2.f32 %v955_v24  ;;  %v944_v27 = vsub.f32 %v912_v59, %v932_v26 }
 0x30d   :  { %2256 = vpow2.f32 %v953_v25 }
 0x30e   :  { %v957_v28 = vmul.f32 1.442695, %v944_v27  ;;  %v2240_v27 = vld [vmem:[#allocation7 + $0x8] sm:$0xff]  }
 0x30f   :  { %v935_v29 = vpop.xlane.xlu1 %934  ;;  %v938_v30 = vpop.xlane.xlu0 %937 }
 0x310   :  { %v2251_v31 = vpop.eup %2250  ;;  %2258 = vpow2.f32 %v957_v28  ;;  %v945_v32 = vsub.f32 %v913_v4, %v935_v29  ;;  %v946_v33 = vsub.f32 %v914_v1, %v938_v30 }
 0x311   :  { %v966_v34 = vsel %vm280_vm2, %v2251_v31, 0.0 }
 0x312   :  { %v2253_v35 = vpop.eup %2252  ;;  %v959_v36 = vmul.f32 1.442695, %v945_v32  ;;  %v961_v37 = vmul.f32 1.442695, %v946_v33  ;;  %967 = vadd.xlane.f32.xlu0 %v966_v34 }
 0x313   :  { %v1078_v38 = vpop.permute.xlu1 %1077  ;;  %v969_v39 = vsel %vm280_vm2, %v2253_v35, 0.0  ;;  %v1154_v55 = vpop.permute.xlu0 %1153 }
 0x314   :  { %2260 = vpow2.f32 %v959_v36  ;;  %970 = vadd.xlane.f32.xlu1 %v969_v39  ;;  %2139 = vmatpush3.msra.mxu1 %v1078_v38 }
 0x315   :  { %2262 = vpow2.f32 %v961_v37  ;;  %2148 = vmatprep.subr.mxu1 %v2400_v0 }
 0x316   :  { %v2255_v40 = vpop.eup %2254 }
 0x317   :  { %v2257_v41 = vpop.eup %2256  ;;  %v975_v42 = vsel %vm280_vm2, %v2255_v40, 0.0  ;;  %v1230_v50 = vpop.permute.xlu1 %1229 }
 0x318   :  { %976 = vadd.xlane.f32.xlu1 %v975_v42  ;;  %v972_v43 = vsel %vm280_vm2, %v2257_v41, 0.0 }
 0x319   :  { %973 = vadd.xlane.f32.xlu0 %v972_v43 }
 0x31a   :  { %v2259_v44 = vpop.eup %2258 }
 0x31b   :  { %v978_v45 = vsel %vm280_vm2, %v2259_v44, 0.0  ;;  %v1397_v51 = vpop.permute.xlu1 %1396 }
 0x31d   :  { %979 = vadd.xlane.f32.xlu0 %v978_v45 }
 0x31e   :  { %v2698_v46 = vpop.eup %2260 }
 0x31f   :  { %v2700_v47 = vpop.eup %2262  ;;  %v981_v48 = vsel %vm280_vm2, %v2698_v46, 0.0 }
 0x320   :  { %982 = vadd.xlane.f32.xlu1 %v981_v48  ;;  %v984_v49 = vsel %vm280_vm2, %v2700_v47, 0.0 }
 0x321   :  { %985 = vadd.xlane.f32.xlu0 %v984_v49 }
 0x331   :  { %1548 = vrot.lane.b32.xlu1 %v2612_v20, %s2402_s17  ;;  %s2408_s17 = smov [#allocation10]  }
 0x332   :  { %s1952_s20 = sshll.u32 %s2408_s17, 4  ;;  %s1953_s20 = int_to_ptr.vmem [resolvable:$true] %s1952_s20 }
 0x333   :  { %p2369_p0 = scmp.lt.s32.totalorder %s1953_s20, %s1953_s20 }
 0x337   :  { %1472 = vrot.lane.b32.xlu0 %v2612_v20, %s2404_s4  ;;  %s2364_s4 = scalar_lea.vmem %s1953_s20, 256 }
 0x338   :  { %p2365_p13 = scmp.ne.s32.totalorder %s1953_s20, %s2364_s4  ;;  %p2370_p1 = scmp.lt.s32.totalorder %s2364_s4, %s2364_s4 }
 0x33a   :  { %p2371_p2 = por %p2370_p1, %p2369_p0 }
 0x33c   :  { %p2372_p3 = pnand %p2371_p2, %p2365_p13 }
 0x34c   :  { %v965_v52 = vpop.xlane.xlu1 %964 }
 0x34d   :  { %2264 = vrcp.f32 %v965_v52 }
 0x357   :  { %v2265_v53 = vpop.eup %2264 }
 0x358   :  { %v995_v54 = vmul.f32 %v2265_v53, %v2249_v11 }
 0x35a   :  { %2136 = vmatmul.mubr.msk.f32.vlgmr.msra.gmra.mrb[10].mxu0 %vm280_vm2, %v995_v54  ;;  %v95_v54 = vunpack.c.l.bf16 %v2561_v3 }
 0x35b   :  { %2144 = vmatpush3.msra.mxu0 %v1154_v55  ;;  %2145 = vmatprep.mubr.msk.f32.mxu0 %vm2401_vm0, %v2400_v0  ;;  %v96_v55 = vunpack.c.h.bf16 %v2561_v3 }
 0x35c   :  { %2153 = vmatprep.subr.mxu0 %v2400_v0 }
 0x39f   :  { %v968_v56 = vpop.xlane.xlu0 %967 }
 0x3a0   :  { %2266 = vrcp.f32 %v968_v56 }
 0x3a1   :  { %v971_v57 = vpop.xlane.xlu1 %970 }
 0x3a2   :  { %2268 = vrcp.f32 %v971_v57 }
 0x3a5   :  { %v977_v58 = vpop.xlane.xlu1 %976 }
 0x3a6   :  { %2270 = vrcp.f32 %v977_v58  ;;  %v974_v59 = vpop.xlane.xlu0 %973 }
 0x3a7   :  { %2272 = vrcp.f32 %v974_v59 }
 0x3aa   :  { %v2267_v60 = vpop.eup %2266  ;;  %v980_v61 = vpop.xlane.xlu0 %979 }
 0x3ab   :  { %v996_v62 = vmul.f32 %v2267_v60, %v2251_v31  ;;  %2274 = vrcp.f32 %v980_v61 }
 0x3ac   :  { %v2269_v63 = vpop.eup %2268 }
 0x3ad   :  { %v997_v1 = vmul.f32 %v2269_v63, %v2253_v35  ;;  %v983_v2 = vpop.xlane.xlu1 %982  ;;  %2141 = vmatmul.mubr.msk.f32.vlgmr.msra.gmra.mrb[18].mxu1 %vm280_vm2, %v996_v62 }
 0x3ae   :  { %2276 = vrcp.f32 %v983_v2  ;;  %v986_v4 = vpop.xlane.xlu0 %985  ;;  %2149 = vmatpush3.msra.mxu1 %v1230_v50  ;;  %2150 = vmatprep.mubr.msk.f32.mxu1 %vm2401_vm0, %v2400_v0 }
 0x3af   :  { %2278 = vrcp.f32 %v986_v4  ;;  %2146 = vmatmul.mubr.msk.f32.vlgmr.msra.gmra.mrb[12].mxu0 %vm280_vm2, %v997_v1  ;;  %2158 = vmatprep.subr.mxu1 %v2400_v0 }
 0x3b0   :  { %v2271_v5 = vpop.eup %2270  ;;  %2154 = vmatpush3.msra.mxu0 %v2612_v20  ;;  %2155 = vmatprep.mubr.msk.f32.mxu0 %vm2401_vm0, %v2400_v0 }
 0x3b1   :  { %v2273_v6 = vpop.eup %2272  ;;  %v999_v7 = vmul.f32 %v2271_v5, %v2255_v40  ;;  %2163 = vmatprep.subr.mxu0 %v2400_v0  ;;  %v1549_v12 = vpop.permute.xlu1 %1548 }
 0x3b2   :  { %v998_v8 = vmul.f32 %v2273_v6, %v2257_v41  ;;  %v1473_v9 = vpop.permute.xlu0 %1472 }
 0x3b3   :  { %2156 = vmatmul.mubr.msk.f32.vlgmr.msra.gmra.mrb[14].mxu0 %vm280_vm2, %v999_v7 }
 0x3b4   :  { %2151 = vmatmul.mubr.msk.f32.vlgmr.msra.gmra.mrb[20].mxu1 %vm280_vm2, %v998_v8  ;;  %2164 = vmatpush3.msra.mxu0 %v1473_v9 }
 0x3b5   :  { %v2275_v10 = vpop.eup %2274  ;;  %2159 = vmatpush3.msra.mxu1 %v1397_v51  ;;  %2160 = vmatprep.mubr.msk.f32.mxu1 %vm2401_vm0, %v2400_v0 }
 0x3b6   :  { %v1000_v20 = vmul.f32 %v2275_v10, %v2259_v44  ;;  %2168 = vmatprep.subr.mxu1 %v2400_v0  ;;  %2165 = vmatprep.mubr.msk.f32.mxu0 %vm2401_vm0, %v2400_v0 }
 0x3b7   :  { %2173 = vmatprep.subr.bf16.mxu0 %v2400_v0 }
 0x3b8   :  { %v2277_v11 = vpop.eup %2276  ;;  %2161 = vmatmul.mubr.msk.f32.vlgmr.msra.gmra.mrb[22].mxu1 %vm280_vm2, %v1000_v20  ;;  %v2241_v20 = vld [vmem:[#allocation9] sm:$0xff]  }
 0x3b9   :  { %v2279_v13 = vpop.eup %2278  ;;  %v1001_v14 = vmul.f32 %v2277_v11, %v2698_v46  ;;  %2169 = vmatpush3.msra.mxu1 %v1549_v12  ;;  %2170 = vmatprep.mubr.msk.f32.mxu1 %vm2401_vm0, %v2400_v0  ;;  %v2242_v11 = vld [vmem:[#allocation9 + $0x8] sm:$0xff]  }
 0x3ba   :  { %v1002_v15 = vmul.f32 %v2279_v13, %v2700_v47  ;;  %2181 = vmatprep.subr.bf16.mxu1 %v2400_v0  ;;  %v2243_v12 = vld [vmem:[%s2819_s8] sm:$0xff]   ;;  %v2244_v13 = vld [vmem:[%s2819_s8 + $0x8] sm:$0xff]  }
 0x3bb   :  { %2166 = vmatmul.mubr.msk.f32.vlgmr.msra.gmra.mrb[16].mxu0 %vm280_vm2, %v1001_v14 }
 0x3bc   :  { %2171 = vmatmul.mubr.msk.f32.vlgmr.msra.gmra.mrb[24].mxu1 %vm280_vm2, %v1002_v15  ;;  %2177 = vmatprep.mubr.msk.bf16.mxu0 %vm2401_vm0, %v2400_v0 }
 0x3bd   :  { %2185 = vmatprep.mubr.msk.bf16.mxu1 %vm2401_vm0, %v2400_v0  ;;  %2174 = vmatpush3.bf16.msra.mxu0 %v2239_v23 }
 0x3be   :  { %2175 = vmatprep.subr.bf16.mxu0 %v2400_v0  ;;  %2182 = vmatpush3.bf16.msra.mxu1 %v2241_v20  ;;  %v2016_v20 = vld [vmem:[%s2824_s13] ss:$0 sm:$0xff] }
 0x3bf   :  { %2183 = vmatprep.subr.bf16.mxu1 %v2400_v0 }
 0x3c1   :  { %2176 = vmatpush3.bf16.msra.mxu0 %v2240_v27  ;;  %v2004_v27 = vld [vmem:[%s2822_s11] ss:$0 sm:$0xff] }
 0x3c2   :  { %2189 = vmatprep.subr.bf16.mxu0 %v2400_v0  ;;  %2184 = vmatpush3.bf16.msra.mxu1 %v2242_v11 }
 0x42d   :  { %v1072_v16 = vpop.f32.mrb[10].mxu0 }
 0x42e   :  { %v2137_v18 = vpop.f32.mrb[11].mxu0 }
 0x480   :  { %v1149_v19 = vpop.f32.mrb[18].mxu1 }
 0x481   :  { %v2142_v21 = vpop.f32.mrb[19].mxu1 }
 0x482   :  { %v1225_v17 = vpop.f32.mrb[12].mxu0 }
 0x483   :  { %v2147_v22 = vpop.f32.mrb[13].mxu0 }
 0x484   :  { %v2003_v22 = vld [vmem:[%s2821_s10] ss:$0 sm:$0xff] }
 0x486   :  { %v1391_v24 = vpop.f32.mrb[14].mxu0 }
 0x487   :  { %v1301_v25 = vpop.f32.mrb[20].mxu1  ;;  %v2157_v26 = vpop.f32.mrb[15].mxu0 }
 0x488   :  { %v2152_v28 = vpop.f32.mrb[21].mxu1 }
 0x48b   :  { %v1468_v29 = vpop.f32.mrb[22].mxu1 }
 0x48c   :  { %v2217_v30 = vpack.i.bf16 %v1468_v29, %v1149_v19  ;;  %v2162_v31 = vpop.f32.mrb[23].mxu1 }
 0x48e   :  { %2218 = vrot.lane.b32.xlu0 %v2217_v30, %s2405_s23  ;;  %v1544_v32 = vpop.f32.mrb[16].mxu0 }
 0x48f   :  { %v2222_v33 = vpack.i.bf16 %v1544_v32, %v1225_v17  ;;  %v1620_v34 = vpop.f32.mrb[24].mxu1  ;;  %v2167_v35 = vpop.f32.mrb[17].mxu0  ;;  %v2245_v32 = vld [vmem:[%s2819_s8 + $0x10] sm:$0xff]  }
 0x490   :  { %v2227_v36 = vpack.i.bf16 %v1620_v34, %v1301_v25  ;;  %v2172_v37 = vpop.f32.mrb[25].mxu1  ;;  %v2005_v34 = vld [vmem:[%s2818_s7] ss:$0 sm:$0xff] }
 0x491   :  { %2223 = vrot.lane.b32.xlu1 %v2222_v33, %s2406_s25  ;;  %v2246_v33 = vld [vmem:[%s2819_s8 + $0x18] sm:$0xff]  }
 0x492   :  { %2228 = vrot.lane.b32.xlu0 %v2227_v36, %s2407_s27 }
 0x500   :  { %v2219_v38 = vpop.permute.xlu0 %2218 }
 0x501   :  { %v2221_v39 = vunpack.i.h.bf16 %v2219_v38  ;;  %v2220_v40 = vunpack.i.l.bf16 %v2219_v38 }
 0x503   :  { %v2224_v41 = vpop.permute.xlu1 %2223  ;;  %v1636_v45 = vsel %vm280_vm2, %v1391_v24, %v2221_v39  ;;  %v1317_v46 = vsel %vm280_vm2, %v1072_v16, %v2220_v40 }
 0x504   :  { %v2226_v42 = vunpack.i.h.bf16 %v2224_v41  ;;  %v2225_v43 = vunpack.i.l.bf16 %v2224_v41  ;;  %v2229_v44 = vpop.permute.xlu0 %2228 }
 0x505   :  { %v2231_v47 = vunpack.i.h.bf16 %v2229_v44  ;;  %v2230_v48 = vunpack.i.l.bf16 %v2229_v44 }
 0x506   :  { %v1319_v49 = vsel %vm1318_vm5, %v1317_v46, %v2225_v43  ;;  %v1637_v50 = vsel %vm1318_vm5, %v1636_v45, %v2226_v42 }
 0x507   :  { %v1638_v51 = vsel %vm1320_vm6, %v1637_v50, %v2231_v47  ;;  %v1321_v52 = vsel %vm1320_vm6, %v1319_v49, %v2230_v48 }
 0x508   :  { %v1639_v53 = vpack.c.bf16 %v1638_v51, %v1321_v52 }
 0x50a   :  { %2178 = vmatmul.mubr.msk.bf16.vlgmr.msra.gmra.mrb[20].mxu0 %vm118_vm1, %v1639_v53 }
 0x50b   :  { %2197 = vmatprep.mubr.msk.bf16.mxu0 %vm2401_vm0, %v2400_v0  ;;  %2190 = vmatpush3.bf16.msra.mxu0 %v2243_v12 }
 0x50c   :  { %2191 = vmatprep.subr.bf16.mxu0 %v2400_v0 }
 0x50f   :  { %2192 = vmatpush3.bf16.msra.mxu0 %v2244_v13 }
 0x510   :  { %2193 = vmatprep.subr.bf16.mxu0 %v2400_v0 }
 0x513   :  { %2194 = vmatpush3.bf16.msra.mxu0 %v2245_v32 }
 0x514   :  { %2195 = vmatprep.subr.bf16.mxu0 %v2400_v0  ;;  %v2009_v0 = vld [vmem:[%s2820_s9] ss:$0 sm:$0xff] }
 0x517   :  { %2196 = vmatpush3.bf16.msra.mxu0 %v2246_v33 }
 0x5dd   :  { %v1693_v56 = vpop.f32.mrb[20].mxu0 }
 0x5de   :  { %v1694_v57 = vadd.f32 %v1693_v56, %v95_v54  ;;  %v2179_v58 = vpop.f32.mrb[21].mxu0 }
 0x5df   :  { %v1696_v59 = vpop.f32.mrb[22].mxu0 }
 0x5e0   :  { %v1697_v60 = vadd.f32 %v1696_v59, %v96_v55  ;;  %v2180_v61 = vpop.f32.mrb[23].mxu0  ;;  %v1702_v62 = vsel %vm118_vm1, %v1694_v57, 0.0 }
 0x5e1   :  { %1703 = vadd.xlane.f32.xlu1 %v1702_v62 }
 0x5e2   :  { %v1705_v63 = vsel %vm118_vm1, %v1697_v60, 0.0 }
 0x5e3   :  { %1706 = vadd.xlane.f32.xlu0 %v1705_v63 }
 0x66e   :  { %v1704_v1 = vpop.xlane.xlu1 %1703 }
 0x66f   :  { %v1708_v2 = vmul.f32 0.03125, %v1704_v1 }
 0x670   :  { %v1707_v4 = vpop.xlane.xlu0 %1706 }
 0x671   :  { %v1710_v5 = vsub.f32 %v1694_v57, %v1708_v2  ;;  %v1709_v6 = vmul.f32 0.03125, %v1707_v4 }
 0x673   :  { %v1711_v7 = vsub.f32 %v1697_v60, %v1709_v6  ;;  %v1712_v8 = vmul.f32 %v1710_v5, %v1710_v5 }
 0x675   :  { %v1714_v3 = vsel %vm118_vm1, %v1712_v8, 0.0  ;;  %v1713_v9 = vmul.f32 %v1711_v7, %v1711_v7 }
 0x676   :  { %1715 = vadd.xlane.f32.xlu0 %v1714_v3  ;;  %v2015_v3 = vld [vmem:[%s2823_s12] ss:$0 sm:$0xff] }
 0x677   :  { %v1717_v10 = vsel %vm118_vm1, %v1713_v9, 0.0 }
 0x678   :  { %1718 = vadd.xlane.f32.xlu1 %v1717_v10 }
 0x703   :  { %v1716_v14 = vpop.xlane.xlu0 %1715 }
 0x704   :  { %v1720_v15 = vmul.f32 0.03125, %v1716_v14 }
 0x705   :  { %v1719_v16 = vpop.xlane.xlu1 %1718 }
 0x706   :  { %v1722_v18 = vadd.f32 1e-05, %v1720_v15  ;;  %v1721_v19 = vmul.f32 0.03125, %v1719_v16 }
 0x708   :  { %2280 = vrsqrt.f32 %v1722_v18  ;;  %v1723_v21 = vadd.f32 1e-05, %v1721_v19 }
 0x70a   :  { %2282 = vrsqrt.f32 %v1723_v21 }
 0x712   :  { %v2281_v17 = vpop.eup %2280 }
 0x713   :  { %v1726_v23 = vmul.f32 %v2281_v17, %v1710_v5 }
 0x714   :  { %v2283_v24 = vpop.eup %2282 }
 0x715   :  { %v1734_v25 = vmul.f32 %v2003_v22, %v1726_v23  ;;  %v1727_v26 = vmul.f32 %v2283_v24, %v1711_v7 }
 0x717   :  { %v1735_v28 = vmul.f32 %v2003_v22, %v1727_v26  ;;  %v1742_v29 = vadd.f32 %v2004_v27, %v1734_v25 }
 0x719   :  { %v1743_v30 = vadd.f32 %v2004_v27, %v1735_v28 }
 0x71b   :  { %v1744_v31 = vpack.c.bf16 %v1743_v30, %v1742_v29 }
 0x71d   :  { %2186 = vmatmul.mubr.msk.bf16.vlgmr.msra.gmra.mrb[28].mxu1 %vm118_vm1, %v1744_v31 }
 0x7f0   :  { %v1805_v35 = vpop.f32.mrb[28].mxu1 }
 0x7f1   :  { %v1806_v36 = vadd.f32 %v2005_v34, %v1805_v35  ;;  %v2187_v37 = vpop.f32.mrb[29].mxu1 }
 0x7f2   :  { %v1808_v38 = vpop.f32.mrb[30].mxu1 }
 0x7f3   :  { %v1809_v39 = vadd.f32 %v2005_v34, %v1808_v38  ;;  %v2188_v40 = vpop.f32.mrb[31].mxu1  ;;  %v1812_v41 = vmax.f32 %v1806_v36, 0.0 }
 0x7f5   :  { %v1813_v42 = vmax.f32 %v1809_v39, 0.0 }
 0x7f7   :  { %v1814_v43 = vpack.c.bf16 %v1813_v42, %v1812_v41 }
 0x7f9   :  { %2198 = vmatmul.mubr.msk.bf16.vlgmr.msra.gmra.mrb[24].mxu0 %vm1854_vm7, %v1814_v43 }
 0x8cc   :  { %v1892_v44 = vpop.f32.mrb[24].mxu0 }
 0x8cd   :  { %v1893_v45 = vadd.f32 %v2009_v0, %v1892_v44  ;;  %v2199_v46 = vpop.f32.mrb[25].mxu0 }
 0x8ce   :  { %v1895_v47 = vpop.f32.mrb[26].mxu0 }
 0x8cf   :  { %v1896_v48 = vadd.f32 %v2009_v0, %v1895_v47  ;;  %v2200_v49 = vpop.f32.mrb[27].mxu0  ;;  %v1899_v50 = vadd.f32 %v1893_v45, %v1742_v29 }
 0x8d1   :  { %v1903_v51 = vsel %vm118_vm1, %v1899_v50, 0.0  ;;  %v1900_v52 = vadd.f32 %v1896_v48, %v1743_v30 }
 0x8d2   :  { %1904 = vadd.xlane.f32.xlu0 %v1903_v51 }
 0x8d3   :  { %v1906_v53 = vsel %vm118_vm1, %v1900_v52, 0.0 }
 0x8d4   :  { %1907 = vadd.xlane.f32.xlu1 %v1906_v53 }
 0x95f   :  { %v1905_v54 = vpop.xlane.xlu0 %1904 }
 0x960   :  { %v1909_v55 = vmul.f32 0.03125, %v1905_v54 }
 0x961   :  { %v1908_v56 = vpop.xlane.xlu1 %1907 }
 0x962   :  { %v1911_v57 = vsub.f32 %v1899_v50, %v1909_v55  ;;  %v1910_v58 = vmul.f32 0.03125, %v1908_v56 }
 0x964   :  { %v1912_v59 = vsub.f32 %v1900_v52, %v1910_v58  ;;  %v1913_v60 = vmul.f32 %v1911_v57, %v1911_v57 }
 0x966   :  { %v1915_v61 = vsel %vm118_vm1, %v1913_v60, 0.0  ;;  %v1914_v62 = vmul.f32 %v1912_v59, %v1912_v59 }
 0x967   :  { %1916 = vadd.xlane.f32.xlu0 %v1915_v61 }
 0x968   :  { %v1918_v63 = vsel %vm118_vm1, %v1914_v62, 0.0 }
 0x969   :  { %1919 = vadd.xlane.f32.xlu1 %v1918_v63 }
 0x9f4   :  { %v1917_v1 = vpop.xlane.xlu0 %1916 }
 0x9f5   :  { %v1921_v2 = vmul.f32 0.03125, %v1917_v1 }
 0x9f6   :  { %v1920_v4 = vpop.xlane.xlu1 %1919 }
 0x9f7   :  { %v1923_v5 = vadd.f32 1e-05, %v1921_v2  ;;  %v1922_v6 = vmul.f32 0.03125, %v1920_v4 }
 0x9f9   :  { %2284 = vrsqrt.f32 %v1923_v5  ;;  %v1924_v7 = vadd.f32 1e-05, %v1922_v6 }
 0x9fb   :  { %2286 = vrsqrt.f32 %v1924_v7 }
 0xa03   :  { %v2285_v8 = vpop.eup %2284 }
 0xa04   :  { %v1927_v9 = vmul.f32 %v2285_v8, %v1911_v57 }
 0xa05   :  { %v2287_v10 = vpop.eup %2286 }
 0xa06   :  { %v1935_v11 = vmul.f32 %v2015_v3, %v1927_v9  ;;  %v1928_v12 = vmul.f32 %v2287_v10, %v1912_v59 }
 0xa08   :  { %v1936_v13 = vmul.f32 %v2015_v3, %v1928_v12  ;;  %v1943_v14 = vadd.f32 %v2016_v20, %v1935_v11 }
 0xa0a   :  { %v1944_v15 = vadd.f32 %v2016_v20, %v1936_v13  ;;  %1945 = vst.msk [vmem:[#allocation10] sm:$0xff] %vm118_vm1, %v1943_v14 }
 0xa0c   :  { %1946 = vst.msk [vmem:[#allocation10 + $0x8] sm:$0xff] %vm118_vm1, %v1944_v15 }
 0xa0d   :  { %2375 = shalt.err (!%p2372_p3)
}
 0xa0e   :  { %s2376_s21 = scalar_lea.hbm %s2825_s14, 256 }
 0xa0f   :  { %p2377_p4 = scmp.ne.s32.totalorder %s2825_s14, %s2376_s21  ;;  %p2380_p5 = scmp.lt.u32.totalorder %s2376_s21, %s2825_s14 }
 0xa11   :  { %p2382_p6 = pnand %p2380_p5, %p2377_p4 }
 0xa13   :  { %2385 = shalt.err (!%p2382_p6)
}
 0xa14   :  { %s2409_s1 = smov 128  }
 0xa15   :  { %1958 = dma.vmem_to_hbm [thread:$0]  %s1953_s20, 256, %s2825_s14, [#allocation6], %s2409_s1, %s2409_s1, %s2405_s23  }
 0xa16   :  { %2392 = dma.done.wait [#allocation6], 256  }
 0xa17   :  { %2393 = vsyncadd [#allocation6], 4294967040 }
 0xa18   :  { %1962 = vsyncpa [#allocation5], 1 }
 0xa19   :  { %1963 = vsyncpa [#allocation8], 1 }
 0xa1a   :  { %1964 = vsyncpa [#allocation6], 1 }

</bundles_post_ra>
